<compile_context>
chip_gen: v5e
topology: v5e:2x2
jax: 0.10.0
libtpu: 0.0.40
codegen_flags: <defaults>
</compile_context>

<pallas_src>
import functools

import numpy as np
import jax
import jax.numpy as jnp
from jax.experimental import pallas as pl
from jax.experimental.pallas import tpu as pltpu

NUM_HEADS = 8
D_MODEL = 64
DIM_PER_HEAD = D_MODEL // NUM_HEADS
SCALE = float(DIM_PER_HEAD) ** 0.5      # multiplied, as in the torch module
LN_EPS = 1e-5
D_EXP = NUM_HEADS * NUM_HEADS * DIM_PER_HEAD   # 512 expanded width
D_BIG = D_EXP + D_MODEL                         # 576 = expanded + residual columns


def _round_up(x, m):
    return (x + m - 1) // m * m


def _select_tiling():
    """Generation-aware row-tile cap and VMEM limit (conservative fallback)."""
    vmem_bytes = 0
    try:
        vmem_bytes = int(pltpu.get_tpu_info().vmem_capacity_bytes)
    except Exception:
        pass
    if vmem_bytes >= 100 * 1024 * 1024:          # v5e / v6e: 128 MiB VMEM
        return 2048, 64 * 1024 * 1024
    return 1024, 40 * 1024 * 1024                # v7x-class (64 MiB / TC) or unknown


_TILE_CAP, _VMEM_LIMIT = _select_tiling()


def _build_constants():
    """0/1 matrices expressing the per-position head attention as 2-D matmuls."""
    H, Dh, D, E = NUM_HEADS, DIM_PER_HEAD, D_MODEL, D_EXP
    hh, tt, dd = np.meshgrid(np.arange(H), np.arange(H), np.arange(Dh), indexing="ij")
    hh, tt, dd = hh.ravel(), tt.ravel(), dd.ravel()
    e = hh * H * Dh + tt * Dh + dd       # score-expansion lane: h*64 + t*8 + d
    f = hh * H * Dh + dd * H + tt        # ctx-expansion lane:   h*64 + d*8 + t
    iq = hh * Dh + dd                    # q / ctx lane: h*8 + d
    ik = tt * Dh + dd                    # k / v lane:   t*8 + d
    ia = hh * H + tt                     # attn / score lane: h*8 + t

    RQ = np.zeros((D, E), np.float32); RQ[iq, e] = 1.0
    RK = np.zeros((D, E), np.float32); RK[ik, e] = 1.0
    SUM_S = np.zeros((E, D), np.float32); SUM_S[e, ia] = 1.0
    GS = np.kron(np.eye(H, dtype=np.float32), np.ones((H, H), np.float32))
    RA = np.zeros((D, E), np.float32); RA[ia, f] = 1.0
    RV = np.zeros((D, E), np.float32); RV[ik, f] = 1.0
    SUM_C = np.zeros((E, D), np.float32); SUM_C[f, iq] = 1.0
    return RQ, RK, SUM_S, GS, RA, RV, SUM_C


def prepare_params(params, compute_dtype=jnp.float32):
    """One-time host-side weight packing (call once, OUTSIDE jit).

    compute_dtype selects the MXU operand dtype (f32 exact, bf16 fast path).
    Biases / LayerNorm params stay f32 (they only touch f32 accumulators).
    """
    RQ, RK, SUM_S, GS, RA, RV, SUM_C = _build_constants()
    wq_t = np.asarray(params["wq"], np.float32).T      # (in, out)
    wk_t = np.asarray(params["wk"], np.float32).T
    wv_t = np.asarray(params["wv"], np.float32).T
    wo_t = np.asarray(params["wo"], np.float32).T
    bq = np.asarray(params["bq"], np.float32)
    bk = np.asarray(params["bk"], np.float32)
    bv = np.asarray(params["bv"], np.float32)
    bo = np.asarray(params["bo"], np.float32)
    gamma = np.asarray(params["gamma"], np.float32)
    beta = np.asarray(params["beta"], np.float32)

    # Fold score expansion (and the sqrt(dim_per_head) scale) into the Q projection;
    # keep the plain projected q in the trailing 64 columns for the residual.
    wq_big = np.concatenate([(wq_t @ RQ) * SCALE, wq_t], axis=1)       # (64, 576)
    wk_big = wk_t @ RK                                                  # (64, 512)
    wv_big = wv_t @ RV                                                  # (64, 512)
    # Fold the final output projection into the context contraction (0/1 selection of
    # Wo^T rows, so the fold is exact in either dtype).
    sum_c_wo = SUM_C @ wo_t                                             # (512, 64)

    # Pack all small vectors into a single (8, 576) constant block (one VMEM tile).
    vecs = np.zeros((8, D_BIG), np.float32)
    vecs[0, :] = np.concatenate([(bq @ RQ) * SCALE, bq])   # bias for the 576-wide q
    vecs[1, :D_EXP] = bk @ RK
    vecs[2, :D_EXP] = bv @ RV
    vecs[3, :D_MODEL] = bo
    vecs[4, :D_MODEL] = gamma
    vecs[5, :D_MODEL] = beta

    cd = compute_dtype
    return {
        "wq_big": jnp.asarray(wq_big, cd),
        "wk_big": jnp.asarray(wk_big, cd),
        "wv_big": jnp.asarray(wv_big, cd),
        "sum_s": jnp.asarray(SUM_S, cd),
        "gs": jnp.asarray(GS, cd),
        "ra": jnp.asarray(RA, cd),
        "sum_c_wo": jnp.asarray(sum_c_wo, cd),
        "vecs": jnp.asarray(vecs, jnp.float32),
    }


def mha_kernel(xq_ref, xk_ref, xv_ref,
               wq_ref, wk_ref, wv_ref,
               sum_s_ref, gs_ref, ra_ref, sum_cwo_ref,
               vec_ref,
               out_ref, *, return_attention):
    f32 = jnp.float32
    cdt = wq_ref.dtype                    # MXU operand dtype (f32 or bf16)

    bq = vec_ref[0:1, :]                  # (1, 576)
    bk = vec_ref[1:2, :D_EXP]             # (1, 512)
    bv = vec_ref[2:3, :D_EXP]
    bo = vec_ref[3:4, :D_MODEL]
    gamma = vec_ref[4:5, :D_MODEL]
    beta = vec_ref[5:6, :D_MODEL]

    xq = xq_ref[...].astype(cdt)
    xk = xk_ref[...].astype(cdt)
    xv = xv_ref[...].astype(cdt)

    # Fused projection + head expansion: one wide MXU matmul per input.
    qx = jnp.dot(xq, wq_ref[...], preferred_element_type=f32) + bq   # (TM, 576)
    kr = jnp.dot(xk, wk_ref[...], preferred_element_type=f32) + bk   # (TM, 512)
    vr = jnp.dot(xv, wv_ref[...], preferred_element_type=f32) + bv   # (TM, 512)
    q_sc = qx[:, :D_EXP]      # scaled, score-expanded projected q
    q_res = qx[:, D_EXP:]     # plain projected q (residual), vreg-aligned slice

    # scores[m, h*8+t] = SCALE * sum_d q[m,h*8+d] * k[m,t*8+d]   (lane-dense 64)
    scores = jnp.dot((q_sc * kr).astype(cdt), sum_s_ref[...],
                     preferred_element_type=f32)

    # Softmax over the 8 lanes of each head group. The row max is constant within every
    # 8-lane group, hence a valid stabilizer; guard the denominator so a head whose
    # scores fully underflow yields zeros instead of Inf/NaN from the approx reciprocal.
    e = jnp.exp(scores - jnp.max(scores, axis=-1, keepdims=True))
    den = jnp.dot(e.astype(cdt), gs_ref[...], preferred_element_type=f32)
    den = jnp.maximum(den, 1e-37)
    r = pl.reciprocal(den, approx=True)   # EUP
    r = r * (2.0 - den * r)               # one Newton step -> ~f32 accuracy
    attn = e * r                          # lane-dense (TM, 64) = (TM, H*H)

    # out[m, :] = sum_f (attn_exp * v_exp)[m, f] * (SUM_C @ Wo^T)[f, :]  (Wo folded)
    ar = jnp.dot(attn.astype(cdt), ra_ref[...], preferred_element_type=f32)  # (TM,512)
    proj = jnp.dot((ar * vr).astype(cdt), sum_cwo_ref[...],
                   preferred_element_type=f32) + bo                          # (TM, 64)

    # residual (projected q) + LayerNorm
    x = proj + q_res
    mean = jnp.mean(x, axis=-1, keepdims=True)
    var = jnp.mean((x - mean) * (x - mean), axis=-1, keepdims=True)
    y = (x - mean) * jax.lax.rsqrt(var + LN_EPS) * gamma + beta

    if return_attention:
        # One 128-lane-wide block: unmasked full-vreg stores, single writeback stream.
        out_ref[...] = jnp.concatenate([y, attn], axis=-1)
    else:
        out_ref[...] = y


@functools.partial(jax.jit, static_argnames=("return_attention",))
def multi_head_attention(query, key, value, prepped, return_attention=True):
    B, S, Dm = query.shape
    H = NUM_HEADS
    M = B * S

    # Tile/grid heuristic: one grid step for small M (per-step overhead ~0.35us is pure
    # loss there); otherwise generation-aware row-tile cap (see _select_tiling).
    if M <= _TILE_CAP:
        tile_m = max(8, _round_up(M, 8))
        grid_m = 1
    else:
        tile_m = _TILE_CAP
        grid_m = pl.cdiv(M, tile_m)
    m_pad = tile_m * grid_m

    def flat(x):
        x = x.reshape(M, Dm).astype(jnp.float32)
        if m_pad != M:
            x = jnp.pad(x, ((0, m_pad - M), (0, 0)))
        return x

    xq, xk, xv = flat(query), flat(key), flat(value)

    out_cols = Dm + H * H if return_attention else Dm

    row_spec = pl.BlockSpec((tile_m, Dm), lambda i: (i, 0))

    def full(a):
        return pl.BlockSpec(a.shape, lambda i: (0,) * a.ndim)

    merged = pl.pallas_call(
        functools.partial(mha_kernel, return_attention=return_attention),
        out_shape=jax.ShapeDtypeStruct((m_pad, out_cols), jnp.float32),
        grid_spec=pltpu.PrefetchScalarGridSpec(
            num_scalar_prefetch=0,
            grid=(grid_m,),
            in_specs=[
                row_spec, row_spec, row_spec,
                full(prepped["wq_big"]), full(prepped["wk_big"]), full(prepped["wv_big"]),
                full(prepped["sum_s"]), full(prepped["gs"]),
                full(prepped["ra"]), full(prepped["sum_c_wo"]),
                full(prepped["vecs"]),
            ],
            out_specs=pl.BlockSpec((tile_m, out_cols), lambda i: (i, 0)),
        ),
        compiler_params=pltpu.CompilerParams(
            dimension_semantics=("parallel",),
            vmem_limit_bytes=_VMEM_LIMIT),
    )(xq, xk, xv,
      prepped["wq_big"], prepped["wk_big"], prepped["wv_big"],
      prepped["sum_s"], prepped["gs"], prepped["ra"], prepped["sum_c_wo"],
      prepped["vecs"])

    out = merged[:M, :Dm].reshape(B, S, Dm)
    if return_attention:
        attn = merged[:M, Dm:].reshape(B, S, H, H)
        return out, attn
    return out, None


def reference_mha(query, key, value, params):
    """Pure-JAX replica of the PyTorch forward (eval mode) for verification."""
    B, S, Dm = query.shape
    H, Dh = NUM_HEADS, Dm // NUM_HEADS
    qp = query @ params["wq"].T + params["bq"]
    kp = key @ params["wk"].T + params["bk"]
    vp = value @ params["wv"].T + params["bv"]
    qh = qp.reshape(B, S, H, Dh)
    kh = kp.reshape(B, S, H, Dh)
    vh = vp.reshape(B, S, H, Dh)
    scores = jnp.einsum("bshd,bstd->bsht", qh, kh) * SCALE
    attn = jax.nn.softmax(scores, axis=-1)
    ctx = jnp.einsum("bsht,bstd->bshd", attn, vh).reshape(B, S, Dm)
    out = ctx @ params["wo"].T + params["bo"]
    x = out + qp
    mean = x.mean(-1, keepdims=True)
    var = ((x - mean) ** 2).mean(-1, keepdims=True)
    out = (x - mean) / jnp.sqrt(var + LN_EPS) * params["gamma"] + params["beta"]
    return out, attn


def init_params(key):
    ks = jax.random.split(key, 8)
    scale = 0.05
    return {
        "wq": scale * jax.random.normal(ks[0], (D_MODEL, D_MODEL), jnp.float32),
        "bq": scale * jax.random.normal(ks[1], (D_MODEL,), jnp.float32),
        "wk": scale * jax.random.normal(ks[2], (D_MODEL, D_MODEL), jnp.float32),
        "bk": scale * jax.random.normal(ks[3], (D_MODEL,), jnp.float32),
        "wv": scale * jax.random.normal(ks[4], (D_MODEL, D_MODEL), jnp.float32),
        "bv": scale * jax.random.normal(ks[5], (D_MODEL,), jnp.float32),
        "wo": scale * jax.random.normal(ks[6], (D_MODEL, D_MODEL), jnp.float32),
        "bo": scale * jax.random.normal(ks[7], (D_MODEL,), jnp.float32),
        "gamma": jnp.ones((D_MODEL,), jnp.float32),
        "beta": jnp.zeros((D_MODEL,), jnp.float32),
    }


if __name__ == "__main__":
    B, S = 2, 8
    root = jax.random.PRNGKey(0)
    kq, kk, kv, kp = jax.random.split(root, 4)
    query = jax.random.normal(kq, (B, S, D_MODEL), jnp.float32)
    key_in = jax.random.normal(kk, (B, S, D_MODEL), jnp.float32)
    value = jax.random.normal(kv, (B, S, D_MODEL), jnp.float32)
    params = init_params(kp)

    ref_out, ref_attn = reference_mha(query, key_in, value, params)

    # f32 path, attention map returned (matches the reference tightly).
    prepped = prepare_params(params)                 # one-time packing, outside jit
    out, attn = multi_head_attention(query, key_in, value, prepped,
                                     return_attention=True)
    out = jax.block_until_ready(out)
    attn = jax.block_until_ready(attn)
    assert out.shape == (B, S, D_MODEL)
    assert attn.shape == (B, S, NUM_HEADS, NUM_HEADS)
    assert jnp.allclose(out, ref_out, atol=1e-4, rtol=1e-4)
    assert jnp.allclose(attn, ref_attn, atol=5e-5, rtol=1e-4)

    # f32 path, attention map NOT materialized (inference variant).
    out_na, _ = multi_head_attention(query, key_in, value, prepped,
                                     return_attention=False)
    out_na = jax.block_until_ready(out_na)
    assert jnp.allclose(out_na, ref_out, atol=1e-4, rtol=1e-4)

    # bf16 MXU path (f32 accumulation) — looser tolerances.
    prepped_bf16 = prepare_params(params, compute_dtype=jnp.bfloat16)
    out_bf, attn_bf = multi_head_attention(query, key_in, value, prepped_bf16,
                                           return_attention=True)
    out_bf = jax.block_until_ready(out_bf)
    attn_bf = jax.block_until_ready(attn_bf)
    assert jnp.allclose(out_bf, ref_out, atol=7e-2, rtol=7e-2)
    assert jnp.allclose(attn_bf, ref_attn, atol=3e-2, rtol=3e-2)

    print("KERNEL_OK")
</pallas_src>

<mosaic_0001>
module attributes {stable_mosaic.version = 11 : i64} {
  func.func @mha_kernel(%arg0: i32, %arg1: memref<16x64xf32, #tpu.memory_space<vmem>>, %arg2: memref<16x64xf32, #tpu.memory_space<vmem>>, %arg3: memref<16x64xf32, #tpu.memory_space<vmem>>, %arg4: memref<64x576xf32, #tpu.memory_space<vmem>>, %arg5: memref<64x512xf32, #tpu.memory_space<vmem>>, %arg6: memref<64x512xf32, #tpu.memory_space<vmem>>, %arg7: memref<512x64xf32, #tpu.memory_space<vmem>>, %arg8: memref<64x64xf32, #tpu.memory_space<vmem>>, %arg9: memref<64x512xf32, #tpu.memory_space<vmem>>, %arg10: memref<512x64xf32, #tpu.memory_space<vmem>>, %arg11: memref<8x576xf32, #tpu.memory_space<vmem>>, %arg12: memref<16x128xf32, #tpu.memory_space<vmem>>) attributes {dimension_semantics = [#tpu.dimension_semantics<parallel>], iteration_bounds = array<i64: 1>, scalar_prefetch = 0 : i64, scratch_operands = 0 : i64, tpu.core_type = #tpu.core_type<tc>, window_params = [{transform_indices = @transform_0, window_bounds = array<i64: 16, 64>}, {transform_indices = @transform_1, window_bounds = array<i64: 16, 64>}, {transform_indices = @transform_2, window_bounds = array<i64: 16, 64>}, {pipeline_mode = #tpu.pipeline_mode<synchronous>, transform_indices = @transform_3, window_bounds = array<i64: 64, 576>}, {pipeline_mode = #tpu.pipeline_mode<synchronous>, transform_indices = @transform_4, window_bounds = array<i64: 64, 512>}, {pipeline_mode = #tpu.pipeline_mode<synchronous>, transform_indices = @transform_5, window_bounds = array<i64: 64, 512>}, {pipeline_mode = #tpu.pipeline_mode<synchronous>, transform_indices = @transform_6, window_bounds = array<i64: 512, 64>}, {pipeline_mode = #tpu.pipeline_mode<synchronous>, transform_indices = @transform_7, window_bounds = array<i64: 64, 64>}, {pipeline_mode = #tpu.pipeline_mode<synchronous>, transform_indices = @transform_8, window_bounds = array<i64: 64, 512>}, {pipeline_mode = #tpu.pipeline_mode<synchronous>, transform_indices = @transform_9, window_bounds = array<i64: 512, 64>}, {pipeline_mode = #tpu.pipeline_mode<synchronous>, transform_indices = @transform_10, window_bounds = array<i64: 8, 576>}, {transform_indices = @transform_11, window_bounds = array<i64: 16, 128>}]} {
    %c0 = arith.constant 0 : index
    %c0_0 = arith.constant 0 : index
    %0 = vector.load %arg11[%c0, %c0_0] : memref<8x576xf32, #tpu.memory_space<vmem>>, vector<1x576xf32>
    %c1 = arith.constant 1 : index
    %c0_1 = arith.constant 0 : index
    %1 = vector.load %arg11[%c1, %c0_1] : memref<8x576xf32, #tpu.memory_space<vmem>>, vector<1x512xf32>
    %c2 = arith.constant 2 : index
    %c0_2 = arith.constant 0 : index
    %2 = vector.load %arg11[%c2, %c0_2] : memref<8x576xf32, #tpu.memory_space<vmem>>, vector<1x512xf32>
    %c3 = arith.constant 3 : index
    %c0_3 = arith.constant 0 : index
    %3 = vector.load %arg11[%c3, %c0_3] : memref<8x576xf32, #tpu.memory_space<vmem>>, vector<1x64xf32>
    %c4 = arith.constant 4 : index
    %c0_4 = arith.constant 0 : index
    %4 = vector.load %arg11[%c4, %c0_4] : memref<8x576xf32, #tpu.memory_space<vmem>>, vector<1x64xf32>
    %c5 = arith.constant 5 : index
    %c0_5 = arith.constant 0 : index
    %5 = vector.load %arg11[%c5, %c0_5] : memref<8x576xf32, #tpu.memory_space<vmem>>, vector<1x64xf32>
    %c0_6 = arith.constant 0 : index
    %c0_7 = arith.constant 0 : index
    %6 = vector.load %arg1[%c0_6, %c0_7] : memref<16x64xf32, #tpu.memory_space<vmem>>, vector<16x64xf32>
    %c0_8 = arith.constant 0 : index
    %c0_9 = arith.constant 0 : index
    %7 = vector.load %arg2[%c0_8, %c0_9] : memref<16x64xf32, #tpu.memory_space<vmem>>, vector<16x64xf32>
    %c0_10 = arith.constant 0 : index
    %c0_11 = arith.constant 0 : index
    %8 = vector.load %arg3[%c0_10, %c0_11] : memref<16x64xf32, #tpu.memory_space<vmem>>, vector<16x64xf32>
    %c0_12 = arith.constant 0 : index
    %c0_13 = arith.constant 0 : index
    %9 = vector.load %arg4[%c0_12, %c0_13] : memref<64x576xf32, #tpu.memory_space<vmem>>, vector<64x576xf32>
    %cst = arith.constant dense<0.000000e+00> : vector<16x576xf32>
    %10 = tpu.matmul %6, %9, %cst {dimension_numbers = #tpu.dot_dimension_numbers<[1], [0], [0], [1], [0, 0, 1, 1], [], []>} : vector<16x64xf32>, vector<64x576xf32>, vector<16x576xf32> -> vector<16x576xf32>
    %11 = vector.broadcast %0 : vector<1x576xf32> to vector<16x576xf32>
    %12 = arith.addf %10, %11 : vector<16x576xf32>
    %c0_14 = arith.constant 0 : index
    %c0_15 = arith.constant 0 : index
    %13 = vector.load %arg5[%c0_14, %c0_15] : memref<64x512xf32, #tpu.memory_space<vmem>>, vector<64x512xf32>
    %cst_16 = arith.constant dense<0.000000e+00> : vector<16x512xf32>
    %14 = tpu.matmul %7, %13, %cst_16 {dimension_numbers = #tpu.dot_dimension_numbers<[1], [0], [0], [1], [0, 0, 1, 1], [], []>} : vector<16x64xf32>, vector<64x512xf32>, vector<16x512xf32> -> vector<16x512xf32>
    %15 = vector.broadcast %1 : vector<1x512xf32> to vector<16x512xf32>
    %16 = arith.addf %14, %15 : vector<16x512xf32>
    %c0_17 = arith.constant 0 : index
    %c0_18 = arith.constant 0 : index
    %17 = vector.load %arg6[%c0_17, %c0_18] : memref<64x512xf32, #tpu.memory_space<vmem>>, vector<64x512xf32>
    %cst_19 = arith.constant dense<0.000000e+00> : vector<16x512xf32>
    %18 = tpu.matmul %8, %17, %cst_19 {dimension_numbers = #tpu.dot_dimension_numbers<[1], [0], [0], [1], [0, 0, 1, 1], [], []>} : vector<16x64xf32>, vector<64x512xf32>, vector<16x512xf32> -> vector<16x512xf32>
    %19 = vector.broadcast %2 : vector<1x512xf32> to vector<16x512xf32>
    %20 = arith.addf %18, %19 : vector<16x512xf32>
    %21 = vector.extract_strided_slice %12 {offsets = [0, 0], sizes = [16, 512], strides = [1, 1]} : vector<16x576xf32> to vector<16x512xf32>
    %22 = vector.extract_strided_slice %12 {offsets = [0, 512], sizes = [16, 64], strides = [1, 1]} : vector<16x576xf32> to vector<16x64xf32>
    %23 = arith.mulf %21, %16 : vector<16x512xf32>
    %c0_20 = arith.constant 0 : index
    %c0_21 = arith.constant 0 : index
    %24 = vector.load %arg7[%c0_20, %c0_21] : memref<512x64xf32, #tpu.memory_space<vmem>>, vector<512x64xf32>
    %cst_22 = arith.constant dense<0.000000e+00> : vector<16x64xf32>
    %25 = tpu.matmul %23, %24, %cst_22 {dimension_numbers = #tpu.dot_dimension_numbers<[1], [0], [0], [1], [0, 0, 1, 1], [], []>} : vector<16x512xf32>, vector<512x64xf32>, vector<16x64xf32> -> vector<16x64xf32>
    %cst_23 = arith.constant dense<0xFF800000> : vector<16xf32>
    %26 = vector.multi_reduction <maximumf>, %25, %cst_23 [1] : vector<16x64xf32> to vector<16xf32>
    %27 = vector.shape_cast %26 : vector<16xf32> to vector<16x1xf32>
    %28 = vector.broadcast %27 : vector<16x1xf32> to vector<16x64xf32>
    %29 = arith.subf %25, %28 : vector<16x64xf32>
    %30 = math.exp %29 : vector<16x64xf32>
    %c0_24 = arith.constant 0 : index
    %c0_25 = arith.constant 0 : index
    %31 = vector.load %arg8[%c0_24, %c0_25] : memref<64x64xf32, #tpu.memory_space<vmem>>, vector<64x64xf32>
    %cst_26 = arith.constant dense<0.000000e+00> : vector<16x64xf32>
    %32 = tpu.matmul %30, %31, %cst_26 {dimension_numbers = #tpu.dot_dimension_numbers<[1], [0], [0], [1], [0, 0, 1, 1], [], []>} : vector<16x64xf32>, vector<64x64xf32>, vector<16x64xf32> -> vector<16x64xf32>
    %cst_27 = arith.constant 9.99999991E-38 : f32
    %33 = vector.broadcast %cst_27 : f32 to vector<16x64xf32>
    %34 = arith.maximumf %32, %33 : vector<16x64xf32>
    %35 = tpu.reciprocal %34 {approx = true} : vector<16x64xf32> -> vector<16x64xf32>
    %36 = arith.mulf %34, %35 : vector<16x64xf32>
    %cst_28 = arith.constant 2.000000e+00 : f32
    %37 = vector.broadcast %cst_28 : f32 to vector<16x64xf32>
    %38 = arith.subf %37, %36 : vector<16x64xf32>
    %39 = arith.mulf %35, %38 : vector<16x64xf32>
    %40 = arith.mulf %30, %39 : vector<16x64xf32>
    %c0_29 = arith.constant 0 : index
    %c0_30 = arith.constant 0 : index
    %41 = vector.load %arg9[%c0_29, %c0_30] : memref<64x512xf32, #tpu.memory_space<vmem>>, vector<64x512xf32>
    %cst_31 = arith.constant dense<0.000000e+00> : vector<16x512xf32>
    %42 = tpu.matmul %40, %41, %cst_31 {dimension_numbers = #tpu.dot_dimension_numbers<[1], [0], [0], [1], [0, 0, 1, 1], [], []>} : vector<16x64xf32>, vector<64x512xf32>, vector<16x512xf32> -> vector<16x512xf32>
    %43 = arith.mulf %42, %20 : vector<16x512xf32>
    %c0_32 = arith.constant 0 : index
    %c0_33 = arith.constant 0 : index
    %44 = vector.load %arg10[%c0_32, %c0_33] : memref<512x64xf32, #tpu.memory_space<vmem>>, vector<512x64xf32>
    %cst_34 = arith.constant dense<0.000000e+00> : vector<16x64xf32>
    %45 = tpu.matmul %43, %44, %cst_34 {dimension_numbers = #tpu.dot_dimension_numbers<[1], [0], [0], [1], [0, 0, 1, 1], [], []>} : vector<16x512xf32>, vector<512x64xf32>, vector<16x64xf32> -> vector<16x64xf32>
    %46 = vector.broadcast %3 : vector<1x64xf32> to vector<16x64xf32>
    %47 = arith.addf %45, %46 : vector<16x64xf32>
    %48 = arith.addf %47, %22 : vector<16x64xf32>
    %cst_35 = arith.constant dense<0.000000e+00> : vector<16xf32>
    %49 = vector.multi_reduction <add>, %48, %cst_35 [1] : vector<16x64xf32> to vector<16xf32>
    %50 = vector.shape_cast %49 : vector<16xf32> to vector<16x1xf32>
    %cst_36 = arith.constant 6.400000e+01 : f32
    %51 = vector.broadcast %cst_36 : f32 to vector<16x1xf32>
    %52 = arith.divf %50, %51 : vector<16x1xf32>
    %53 = vector.broadcast %52 : vector<16x1xf32> to vector<16x64xf32>
    %54 = arith.subf %48, %53 : vector<16x64xf32>
    %55 = vector.broadcast %52 : vector<16x1xf32> to vector<16x64xf32>
    %56 = arith.subf %48, %55 : vector<16x64xf32>
    %57 = arith.mulf %54, %56 : vector<16x64xf32>
    %cst_37 = arith.constant dense<0.000000e+00> : vector<16xf32>
    %58 = vector.multi_reduction <add>, %57, %cst_37 [1] : vector<16x64xf32> to vector<16xf32>
    %59 = vector.shape_cast %58 : vector<16xf32> to vector<16x1xf32>
    %cst_38 = arith.constant 6.400000e+01 : f32
    %60 = vector.broadcast %cst_38 : f32 to vector<16x1xf32>
    %61 = arith.divf %59, %60 : vector<16x1xf32>
    %62 = vector.broadcast %52 : vector<16x1xf32> to vector<16x64xf32>
    %63 = arith.subf %48, %62 : vector<16x64xf32>
    %cst_39 = arith.constant 9.99999974E-6 : f32
    %64 = vector.broadcast %cst_39 : f32 to vector<16x1xf32>
    %65 = arith.addf %61, %64 : vector<16x1xf32>
    %66 = math.rsqrt %65 : vector<16x1xf32>
    %67 = vector.broadcast %66 : vector<16x1xf32> to vector<16x64xf32>
    %68 = arith.mulf %63, %67 : vector<16x64xf32>
    %69 = vector.broadcast %4 : vector<1x64xf32> to vector<16x64xf32>
    %70 = arith.mulf %68, %69 : vector<16x64xf32>
    %71 = vector.broadcast %5 : vector<1x64xf32> to vector<16x64xf32>
    %72 = arith.addf %70, %71 : vector<16x64xf32>
    %73 = tpu.concatenate %72, %40 in 1 : vector<16x64xf32>, vector<16x64xf32> -> vector<16x128xf32>
    %c0_40 = arith.constant 0 : index
    %c0_41 = arith.constant 0 : index
    %74 = vector.load %arg12[%c0_40, %c0_41] : memref<16x128xf32, #tpu.memory_space<vmem>>, vector<16x128xf32>
    tpu.vector_store %arg12[%c0_40, %c0_41], %73 {strides = array<i32>} : memref<16x128xf32, #tpu.memory_space<vmem>>, vector<16x128xf32>,
    return
  }
  func.func @transform_0(%arg0: i32) -> (i32, i32) {
    %c0_i32 = arith.constant 0 : i32
    %c0_i32_0 = arith.constant 0 : i32
    return %arg0, %c0_i32 : i32, i32
  }
  func.func @transform_1(%arg0: i32) -> (i32, i32) {
    %c0_i32 = arith.constant 0 : i32
    %c0_i32_0 = arith.constant 0 : i32
    return %arg0, %c0_i32 : i32, i32
  }
  func.func @transform_2(%arg0: i32) -> (i32, i32) {
    %c0_i32 = arith.constant 0 : i32
    %c0_i32_0 = arith.constant 0 : i32
    return %arg0, %c0_i32 : i32, i32
  }
  func.func @transform_3(%arg0: i32) -> (i32, i32) {
    %c0_i32 = arith.constant 0 : i32
    %c0_i32_0 = arith.constant 0 : i32
    %c0_i32_1 = arith.constant 0 : i32
    return %c0_i32, %c0_i32_0 : i32, i32
  }
  func.func @transform_4(%arg0: i32) -> (i32, i32) {
    %c0_i32 = arith.constant 0 : i32
    %c0_i32_0 = arith.constant 0 : i32
    %c0_i32_1 = arith.constant 0 : i32
    return %c0_i32, %c0_i32_0 : i32, i32
  }
  func.func @transform_5(%arg0: i32) -> (i32, i32) {
    %c0_i32 = arith.constant 0 : i32
    %c0_i32_0 = arith.constant 0 : i32
    %c0_i32_1 = arith.constant 0 : i32
    return %c0_i32, %c0_i32_0 : i32, i32
  }
  func.func @transform_6(%arg0: i32) -> (i32, i32) {
    %c0_i32 = arith.constant 0 : i32
    %c0_i32_0 = arith.constant 0 : i32
    %c0_i32_1 = arith.constant 0 : i32
    return %c0_i32, %c0_i32_0 : i32, i32
  }
  func.func @transform_7(%arg0: i32) -> (i32, i32) {
    %c0_i32 = arith.constant 0 : i32
    %c0_i32_0 = arith.constant 0 : i32
    %c0_i32_1 = arith.constant 0 : i32
    return %c0_i32, %c0_i32_0 : i32, i32
  }
  func.func @transform_8(%arg0: i32) -> (i32, i32) {
    %c0_i32 = arith.constant 0 : i32
    %c0_i32_0 = arith.constant 0 : i32
    %c0_i32_1 = arith.constant 0 : i32
    return %c0_i32, %c0_i32_0 : i32, i32
  }
  func.func @transform_9(%arg0: i32) -> (i32, i32) {
    %c0_i32 = arith.constant 0 : i32
    %c0_i32_0 = arith.constant 0 : i32
    %c0_i32_1 = arith.constant 0 : i32
    return %c0_i32, %c0_i32_0 : i32, i32
  }
  func.func @transform_10(%arg0: i32) -> (i32, i32) {
    %c0_i32 = arith.constant 0 : i32
    %c0_i32_0 = arith.constant 0 : i32
    %c0_i32_1 = arith.constant 0 : i32
    return %c0_i32, %c0_i32_0 : i32, i32
  }
  func.func @transform_11(%arg0: i32) -> (i32, i32) {
    %c0_i32 = arith.constant 0 : i32
    %c0_i32_0 = arith.constant 0 : i32
    return %arg0, %c0_i32 : i32, i32
  }
}

</mosaic_0001>

<bundles_post_ra>
// kernel: multi_head_attention.1
= control target key start
LH: loop header
LB: loop body
LE: loop exit
PB: predicated region body
PF: predicated region fallthrough
CT: control target
= control target key end

     0   :  { %vm105_vm0 = vcmask 523264   ;;  %s2196_s3 = inlined_call_operand.vmem [shape: f32[64,576], index: 3, kind: input, shape index: {}]   ;;  %s2197_s0 = inlined_call_operand.vmem [shape: f32[16,64], index: 0, kind: input, shape index: {}]   ;;  %s2198_s4 = inlined_call_operand.vmem [shape: f32[64,512], index: 4, kind: input, shape index: {}]   ;;  %s2199_s1 = inlined_call_operand.vmem [shape: f32[16,64], index: 1, kind: input, shape index: {}]   ;;  %s2200_s5 = inlined_call_operand.vmem [shape: f32[64,512], index: 5, kind: input, shape index: {}]   ;;  %s2201_s6 = inlined_call_operand.vmem [shape: f32[512,64], index: 6, kind: input, shape index: {}]   ;;  %s2202_s2 = inlined_call_operand.vmem [shape: f32[16,64], index: 2, kind: input, shape index: {}]   ;;  %s2203_s10 = inlined_call_operand.vmem [shape: f32[8,576], index: 10, kind: input, shape index: {}]   ;;  %s2204_s7 = inlined_call_operand.vmem [shape: f32[64,64], index: 7, kind: input, shape index: {}]   ;;  %s2205_s8 = inlined_call_operand.vmem [shape: f32[64,512], index: 8, kind: input, shape index: {}]   ;;  %s2206_s9 = inlined_call_operand.vmem [shape: f32[512,64], index: 9, kind: input, shape index: {}]   ;;  %s2207_s11 = inlined_call_operand.vmem [shape: f32[16,128], index: 11, kind: output, shape index: {}]  }
   0x1   :  { %v89_v0 = vld [vmem:[%s2196_s3 + $0x118] sm:$0xff]  ;;  %v90_v1 = vld [vmem:[%s2196_s3 + $0x120] sm:$0xff]  ;;  %v91_v2 = vld [vmem:[%s2196_s3 + $0x128] sm:$0xff] }
   0x2   :  { %120 = vmatpush.msra.mxu0 %v89_v0  ;;  %143 = vmatpush.msra.mxu1 %v90_v1  ;;  %v92_v3 = vld [vmem:[%s2196_s3 + $0x130] sm:$0xff]  ;;  %v85_v5 = vld [vmem:[%s2196_s3 + $0xf8] sm:$0xff]  ;;  %v86_v6 = vld [vmem:[%s2196_s3 + $0x100] sm:$0xff] }
   0x3   :  { %v84_v4 = vld [vmem:[%s2196_s3 + $0xf0] sm:$0xff]  ;;  %166 = vmatpush.msra.mxu2 %v91_v2  ;;  %189 = vmatpush.msra.mxu3 %v92_v3  ;;  %v87_v7 = vld [vmem:[%s2196_s3 + $0x108] sm:$0xff]  ;;  %v81_v10 = vld [vmem:[%s2196_s3 + $0xd8] sm:$0xff] }
   0x4   :  { %v79_v8 = vld [vmem:[%s2196_s3 + $0xc8] sm:$0xff]  ;;  %121 = vmatpush.msra.mxu0 %v84_v4  ;;  %144 = vmatpush.msra.mxu1 %v85_v5  ;;  %v80_v9 = vld [vmem:[%s2196_s3 + $0xd0] sm:$0xff]  ;;  %v82_v11 = vld [vmem:[%s2196_s3 + $0xe0] sm:$0xff] }
   0x5   :  { %167 = vmatpush.msra.mxu2 %v86_v6  ;;  %190 = vmatpush.msra.mxu3 %v87_v7  ;;  %v74_v12 = vld [vmem:[%s2196_s3 + $0xa0] sm:$0xff]  ;;  %v75_v13 = vld [vmem:[%s2196_s3 + $0xa8] sm:$0xff]  ;;  %v76_v14 = vld [vmem:[%s2196_s3 + $0xb0] sm:$0xff] }
   0x6   :  { %122 = vmatpush.msra.mxu0 %v79_v8  ;;  %145 = vmatpush.msra.mxu1 %v80_v9  ;;  %v77_v15 = vld [vmem:[%s2196_s3 + $0xb8] sm:$0xff]  ;;  %v70_v17 = vld [vmem:[%s2196_s3 + $0x80] sm:$0xff]  ;;  %v71_v18 = vld [vmem:[%s2196_s3 + $0x88] sm:$0xff] }
   0x7   :  { %168 = vmatpush.msra.mxu2 %v81_v10  ;;  %191 = vmatpush.msra.mxu3 %v82_v11  ;;  %v69_v16 = vld [vmem:[%s2196_s3 + $0x78] sm:$0xff]  ;;  %v72_v19 = vld [vmem:[%s2196_s3 + $0x90] sm:$0xff]  ;;  %v66_v22 = vld [vmem:[%s2196_s3 + $0x60] sm:$0xff] }
   0x8   :  { %123 = vmatpush.msra.mxu0 %v74_v12  ;;  %146 = vmatpush.msra.mxu1 %v75_v13  ;;  %v64_v20 = vld [vmem:[%s2196_s3 + $0x50] sm:$0xff]  ;;  %v65_v21 = vld [vmem:[%s2196_s3 + $0x58] sm:$0xff]  ;;  %v67_v23 = vld [vmem:[%s2196_s3 + $0x68] sm:$0xff] }
   0x9   :  { %169 = vmatpush.msra.mxu2 %v76_v14  ;;  %192 = vmatpush.msra.mxu3 %v77_v15  ;;  %v59_v24 = vld [vmem:[%s2196_s3 + $0x28] sm:$0xff]  ;;  %v60_v25 = vld [vmem:[%s2196_s3 + $0x30] sm:$0xff]  ;;  %v61_v26 = vld [vmem:[%s2196_s3 + $0x38] sm:$0xff] }
   0xa   :  { %124 = vmatpush.msra.mxu0 %v69_v16  ;;  %147 = vmatpush.msra.mxu1 %v70_v17  ;;  %v62_v27 = vld [vmem:[%s2196_s3 + $0x40] sm:$0xff]  ;;  %v55_v29 = vld [vmem:[%s2196_s3 + $0x8] sm:$0xff]  ;;  %v56_v30 = vld [vmem:[%s2196_s3 + $0x10] sm:$0xff] }
   0xb   :  { %170 = vmatpush.msra.mxu2 %v71_v18  ;;  %193 = vmatpush.msra.mxu3 %v72_v19  ;;  %v54_v28 = vld [vmem:[%s2196_s3] sm:$0xff]  ;;  %v57_v31 = vld [vmem:[%s2196_s3 + $0x18] sm:$0xff]  ;;  %v256_v34 = vld [vmem:[%s2198_s4 + $0xe8] sm:$0xff] }
   0xc   :  { %125 = vmatpush.msra.mxu0 %v64_v20  ;;  %148 = vmatpush.msra.mxu1 %v65_v21  ;;  %v1310_v32 = vld [vmem:[%s2197_s0] sm:$0xff]  ;;  %v93_v33 = vld [vmem:[%s2196_s3 + $0x138] sm:$0xff]  ;;  %v257_v36 = vld [vmem:[%s2198_s4 + $0xf0] sm:$0xff] }
   0xd   :  { %171 = vmatpush.msra.mxu2 %v66_v22  ;;  %194 = vmatpush.msra.mxu3 %v67_v23  ;;  %v255_v35 = vld [vmem:[%s2198_s4 + $0xe0] sm:$0xff]  ;;  %v88_v37 = vld [vmem:[%s2196_s3 + $0x110] sm:$0xff]  ;;  %v252_v38 = vld [vmem:[%s2198_s4 + $0xc8] sm:$0xff] }
   0xe   :  { %126 = vmatpush.msra.mxu0 %v59_v24  ;;  %149 = vmatpush.msra.mxu1 %v60_v25  ;;  %v251_v39 = vld [vmem:[%s2198_s4 + $0xc0] sm:$0xff]  ;;  %v253_v40 = vld [vmem:[%s2198_s4 + $0xd0] sm:$0xff]  ;;  %v83_v41 = vld [vmem:[%s2196_s3 + $0xe8] sm:$0xff] }
   0xf   :  { %172 = vmatpush.msra.mxu2 %v61_v26  ;;  %195 = vmatpush.msra.mxu3 %v62_v27  ;;  %v248_v42 = vld [vmem:[%s2198_s4 + $0xa8] sm:$0xff]  ;;  %v247_v43 = vld [vmem:[%s2198_s4 + $0xa0] sm:$0xff]  ;;  %v249_v44 = vld [vmem:[%s2198_s4 + $0xb0] sm:$0xff] }
  0x10   :  { %127 = vmatpush.msra.mxu0 %v54_v28  ;;  %150 = vmatpush.msra.mxu1 %v55_v29  ;;  %v78_v45 = vld [vmem:[%s2196_s3 + $0xc0] sm:$0xff]  ;;  %v244_v46 = vld [vmem:[%s2198_s4 + $0x88] sm:$0xff]  ;;  %v245_v48 = vld [vmem:[%s2198_s4 + $0x90] sm:$0xff] }
  0x11   :  { %173 = vmatpush.msra.mxu2 %v56_v30  ;;  %196 = vmatpush.msra.mxu3 %v57_v31  ;;  %v243_v47 = vld [vmem:[%s2198_s4 + $0x80] sm:$0xff]  ;;  %v1371_v49 = vld [vmem:[%s2197_s0 + $0x8] sm:$0xff]  ;;  %v73_v50 = vld [vmem:[%s2196_s3 + $0x98] sm:$0xff] }
  0x12   :  { %1097 = vmatmul.msk.f32.vlgmr.msra.gmra.mxu0 %vm105_vm0, %v1310_v32  ;;  %1099 = vmatmul.msk.f32.vlgmr.msra.gmra.mxu1 %vm105_vm0, %v1310_v32  ;;  %v240_v51 = vld [vmem:[%s2198_s4 + $0x68] sm:$0xff]  ;;  %v239_v52 = vld [vmem:[%s2198_s4 + $0x60] sm:$0xff]  ;;  %v241_v53 = vld [vmem:[%s2198_s4 + $0x70] sm:$0xff] }
  0x13   :  { %1101 = vmatmul.msk.f32.vlgmr.msra.gmra.mxu2 %vm105_vm0, %v1310_v32  ;;  %1103 = vmatmul.msk.f32.vlgmr.msra.gmra.mxu3 %vm105_vm0, %v1310_v32  ;;  %v68_v54 = vld [vmem:[%s2196_s3 + $0x70] sm:$0xff]  ;;  %v236_v55 = vld [vmem:[%s2198_s4 + $0x48] sm:$0xff]  ;;  %v235_v56 = vld [vmem:[%s2198_s4 + $0x40] sm:$0xff] }
  0x14   :  { %212 = vmatpush.msrb.mxu0 %v93_v33  ;;  %305 = vmatpush.msrb.mxu2 %v256_v34  ;;  %v237_v57 = vld [vmem:[%s2198_s4 + $0x50] sm:$0xff]  ;;  %v63_v58 = vld [vmem:[%s2196_s3 + $0x48] sm:$0xff]  ;;  %v231_v60 = vld [vmem:[%s2198_s4 + $0x20] sm:$0xff] }
  0x15   :  { %282 = vmatpush.msrb.mxu1 %v255_v35  ;;  %328 = vmatpush.msrb.mxu3 %v257_v36  ;;  %v232_v59 = vld [vmem:[%s2198_s4 + $0x28] sm:$0xff]  ;;  %v233_v61 = vld [vmem:[%s2198_s4 + $0x30] sm:$0xff]  ;;  %v58_v62 = vld [vmem:[%s2196_s3 + $0x20] sm:$0xff] }
  0x16   :  { %213 = vmatpush.msrb.mxu0 %v88_v37  ;;  %306 = vmatpush.msrb.mxu2 %v252_v38  ;;  %v228_v63 = vld [vmem:[%s2198_s4 + $0x8] sm:$0xff]  ;;  %v227_v0 = vld [vmem:[%s2198_s4] sm:$0xff]  ;;  %v229_v1 = vld [vmem:[%s2198_s4 + $0x10] sm:$0xff] }
  0x17   :  { %283 = vmatpush.msrb.mxu1 %v251_v39  ;;  %329 = vmatpush.msrb.mxu3 %v253_v40  ;;  %v1432_v2 = vld [vmem:[%s2199_s1] sm:$0xff]  ;;  %v258_v3 = vld [vmem:[%s2198_s4 + $0xf8] sm:$0xff]  ;;  %v395_v5 = vld [vmem:[%s2200_s5 + $0xe8] sm:$0xff] }
  0x18   :  { %214 = vmatpush.msrb.mxu0 %v83_v41  ;;  %307 = vmatpush.msrb.mxu2 %v248_v42  ;;  %v394_v4 = vld [vmem:[%s2200_s5 + $0xe0] sm:$0xff]  ;;  %v396_v6 = vld [vmem:[%s2200_s5 + $0xf0] sm:$0xff]  ;;  %v254_v7 = vld [vmem:[%s2198_s4 + $0xd8] sm:$0xff] }
  0x19   :  { %284 = vmatpush.msrb.mxu1 %v247_v43  ;;  %330 = vmatpush.msrb.mxu3 %v249_v44  ;;  %v390_v8 = vld [vmem:[%s2200_s5 + $0xc0] sm:$0xff]  ;;  %v391_v9 = vld [vmem:[%s2200_s5 + $0xc8] sm:$0xff]  ;;  %v392_v10 = vld [vmem:[%s2200_s5 + $0xd0] sm:$0xff] }
  0x1a   :  { %215 = vmatpush.msrb.mxu0 %v78_v45  ;;  %308 = vmatpush.msrb.mxu2 %v244_v46  ;;  %v250_v11 = vld [vmem:[%s2198_s4 + $0xb8] sm:$0xff]  ;;  %v386_v12 = vld [vmem:[%s2200_s5 + $0xa0] sm:$0xff]  ;;  %v387_v13 = vld [vmem:[%s2200_s5 + $0xa8] sm:$0xff] }
  0x1b   :  { %285 = vmatpush.msrb.mxu1 %v243_v47  ;;  %331 = vmatpush.msrb.mxu3 %v245_v48  ;;  %v388_v14 = vld [vmem:[%s2200_s5 + $0xb0] sm:$0xff]  ;;  %v246_v15 = vld [vmem:[%s2198_s4 + $0x98] sm:$0xff]  ;;  %v1484_v16 = vld [vmem:[%s2199_s1 + $0x8] sm:$0xff]  ;;  %s1149_s1 = smov 64  }
  0x1c   :  { %1098 = vmatmul.msk.f32.gmra.mxu0 %vm105_vm0, %v1371_v49  ;;  %1100 = vmatmul.msk.f32.gmra.mxu1 %vm105_vm0, %v1371_v49  ;;  %v242_v17 = vld [vmem:[%s2198_s4 + $0x78] sm:$0xff]  ;;  %v382_v18 = vld [vmem:[%s2200_s5 + $0x80] sm:$0xff]  ;;  %v383_v19 = vld [vmem:[%s2200_s5 + $0x88] sm:$0xff] }
  0x1d   :  { %1102 = vmatmul.msk.f32.gmra.mxu2 %vm105_vm0, %v1371_v49  ;;  %1104 = vmatmul.msk.f32.gmra.mxu3 %vm105_vm0, %v1371_v49  ;;  %v238_v20 = vld [vmem:[%s2198_s4 + $0x58] sm:$0xff]  ;;  %v384_v21 = vld [vmem:[%s2200_s5 + $0x90] sm:$0xff]  ;;  %v378_v22 = vld [vmem:[%s2200_s5 + $0x60] sm:$0xff] }
  0x1e   :  { %216 = vmatpush.msrb.mxu0 %v73_v50  ;;  %309 = vmatpush.msrb.mxu2 %v240_v51  ;;  %v379_v23 = vld [vmem:[%s2200_s5 + $0x68] sm:$0xff]  ;;  %v234_v24 = vld [vmem:[%s2198_s4 + $0x38] sm:$0xff]  ;;  %v380_v25 = vld [vmem:[%s2200_s5 + $0x70] sm:$0xff] }
  0x1f   :  { %286 = vmatpush.msrb.mxu1 %v239_v52  ;;  %332 = vmatpush.msrb.mxu3 %v241_v53  ;;  %v374_v26 = vld [vmem:[%s2200_s5 + $0x40] sm:$0xff]  ;;  %v375_v27 = vld [vmem:[%s2200_s5 + $0x48] sm:$0xff]  ;;  %v230_v28 = vld [vmem:[%s2198_s4 + $0x18] sm:$0xff] }
  0x20   :  { %217 = vmatpush.msrb.mxu0 %v68_v54  ;;  %310 = vmatpush.msrb.mxu2 %v236_v55  ;;  %v376_v29 = vld [vmem:[%s2200_s5 + $0x50] sm:$0xff]  ;;  %v370_v30 = vld [vmem:[%s2200_s5 + $0x20] sm:$0xff]  ;;  %v397_v31 = vld [vmem:[%s2200_s5 + $0xf8] sm:$0xff] }
  0x21   :  { %287 = vmatpush.msrb.mxu1 %v235_v56  ;;  %333 = vmatpush.msrb.mxu3 %v237_v57  ;;  %v366_v33 = vld [vmem:[%s2200_s5] sm:$0xff]  ;;  %v372_v34 = vld [vmem:[%s2200_s5 + $0x30] sm:$0xff]  ;;  %v528_v35 = vld [vmem:[%s2201_s6 + $0x78] sm:$0xff] }
  0x22   :  { %218 = vmatpush.msrb.mxu0 %v63_v58  ;;  %311 = vmatpush.msrb.mxu2 %v232_v59  ;;  %v393_v36 = vld [vmem:[%s2200_s5 + $0xd8] sm:$0xff]  ;;  %v367_v37 = vld [vmem:[%s2200_s5 + $0x8] sm:$0xff]  ;;  %v368_v38 = vld [vmem:[%s2200_s5 + $0x10] sm:$0xff] }
  0x23   :  { %288 = vmatpush.msrb.mxu1 %v231_v60  ;;  %334 = vmatpush.msrb.mxu3 %v233_v61  ;;  %v527_v39 = vld [vmem:[%s2201_s6 + $0x70] sm:$0xff]  ;;  %v389_v40 = vld [vmem:[%s2200_s5 + $0xb8] sm:$0xff]  ;;  %v526_v43 = vld [vmem:[%s2201_s6 + $0x68] sm:$0xff] }
  0x24   :  { %219 = vmatpush.msrb.mxu0 %v58_v62  ;;  %312 = vmatpush.msrb.mxu2 %v228_v63  ;;  %v544_v41 = vld [vmem:[%s2201_s6 + $0xf8] sm:$0xff]  ;;  %v543_v45 = vld [vmem:[%s2201_s6 + $0xf0] sm:$0xff]  ;;  %v525_v46 = vld [vmem:[%s2201_s6 + $0x60] sm:$0xff] }
  0x25   :  { %289 = vmatpush.msrb.mxu1 %v227_v0  ;;  %335 = vmatpush.msrb.mxu3 %v229_v1  ;;  %v560_v42 = vld [vmem:[%s2201_s6 + $0x178] sm:$0xff]  ;;  %v559_v47 = vld [vmem:[%s2201_s6 + $0x170] sm:$0xff]  ;;  %v542_v51 = vld [vmem:[%s2201_s6 + $0xe8] sm:$0xff] }
  0x26   :  { %1105 = vmatmul.msk.f32.vlgmr.msrb.gmra.mxu0 %vm105_vm0, %v1310_v32  ;;  %1107 = vmatmul.msk.f32.vlgmr.msrb.gmra.mxu1 %vm105_vm0, %v1432_v2  ;;  %v371_v32 = vld [vmem:[%s2200_s5 + $0x28] sm:$0xff]  ;;  %v385_v44 = vld [vmem:[%s2200_s5 + $0x98] sm:$0xff]  ;;  %v523_v50 = vld [vmem:[%s2201_s6 + $0x50] sm:$0xff] }
  0x27   :  { %1109 = vmatmul.msk.f32.vlgmr.msrb.gmra.mxu2 %vm105_vm0, %v1432_v2  ;;  %1111 = vmatmul.msk.f32.vlgmr.msrb.gmra.mxu3 %vm105_vm0, %v1432_v2  ;;  %v381_v48 = vld [vmem:[%s2200_s5 + $0x78] sm:$0xff]  ;;  %v558_v52 = vld [vmem:[%s2201_s6 + $0x168] sm:$0xff]  ;;  %v541_v55 = vld [vmem:[%s2201_s6 + $0xe0] sm:$0xff] }
  0x28   :  { %351 = vmatpush.msra.mxu0 %v258_v3  ;;  %421 = vmatpush.msra.mxu1 %v394_v4  ;;  %v377_v53 = vld [vmem:[%s2200_s5 + $0x58] sm:$0xff]  ;;  %v522_v54 = vld [vmem:[%s2201_s6 + $0x48] sm:$0xff]  ;;  %v557_v56 = vld [vmem:[%s2201_s6 + $0x160] sm:$0xff] }
  0x29   :  { %444 = vmatpush.msra.mxu2 %v395_v5  ;;  %467 = vmatpush.msra.mxu3 %v396_v6  ;;  %v373_v57 = vld [vmem:[%s2200_s5 + $0x38] sm:$0xff]  ;;  %v521_v58 = vld [vmem:[%s2201_s6 + $0x40] sm:$0xff]  ;;  %v539_v0 = vld [vmem:[%s2201_s6 + $0xd0] sm:$0xff] }
  0x2a   :  { %352 = vmatpush.msra.mxu0 %v254_v7  ;;  %422 = vmatpush.msra.mxu1 %v390_v8  ;;  %v540_v59 = vld [vmem:[%s2201_s6 + $0xd8] sm:$0xff]  ;;  %v52_v61 = vld [vmem:[%s2202_s2] sm:$0xff]  ;;  %v555_v1 = vld [vmem:[%s2201_s6 + $0x150] sm:$0xff] }
  0x2b   :  { %445 = vmatpush.msra.mxu2 %v391_v9  ;;  %468 = vmatpush.msra.mxu3 %v392_v10  ;;  %v556_v60 = vld [vmem:[%s2201_s6 + $0x158] sm:$0xff]  ;;  %v519_v3 = vld [vmem:[%s2201_s6 + $0x30] sm:$0xff]  ;;  %v538_v4 = vld [vmem:[%s2201_s6 + $0xc8] sm:$0xff] }
  0x2c   :  { %353 = vmatpush.msra.mxu0 %v250_v11  ;;  %423 = vmatpush.msra.mxu1 %v386_v12  ;;  %v369_v62 = vld [vmem:[%s2200_s5 + $0x18] sm:$0xff]  ;;  %v554_v5 = vld [vmem:[%s2201_s6 + $0x148] sm:$0xff]  ;;  %v575_v6 = vld [vmem:[%s2201_s6 + $0x1f0] sm:$0xff] }
  0x2d   :  { %446 = vmatpush.msra.mxu2 %v387_v13  ;;  %469 = vmatpush.msra.mxu3 %v388_v14  ;;  %v520_v63 = vld [vmem:[%s2201_s6 + $0x38] sm:$0xff]  ;;  %v518_v7 = vld [vmem:[%s2201_s6 + $0x28] sm:$0xff]  ;;  %v537_v8 = vld [vmem:[%s2201_s6 + $0xc0] sm:$0xff] }
  0x2e   :  { %354 = vmatpush.msra.mxu0 %v246_v15  ;;  %1108 = vmatmul.msk.f32.gmra.mxu1 %vm105_vm0, %v1484_v16  ;;  %v553_v9 = vld [vmem:[%s2201_s6 + $0x140] sm:$0xff]  ;;  %v574_v10 = vld [vmem:[%s2201_s6 + $0x1e8] sm:$0xff]  ;;  %v536_v12 = vld [vmem:[%s2201_s6 + $0xb8] sm:$0xff] }
  0x2f   :  { %1106 = vmatmul.msk.f32.gmra.mxu0 %vm105_vm0, %v1371_v49  ;;  %1110 = vmatmul.msk.f32.gmra.mxu2 %vm105_vm0, %v1484_v16  ;;  %v524_v49 = vld [vmem:[%s2201_s6 + $0x58] sm:$0xff]  ;;  %v517_v11 = vld [vmem:[%s2201_s6 + $0x20] sm:$0xff]  ;;  %v53_v15 = vld [vmem:[%s2202_s2 + $0x8] sm:$0xff] }
  0x30   :  { %1112 = vmatmul.msk.f32.gmra.mxu3 %vm105_vm0, %v1484_v16  ;;  %355 = vmatpush.msra.mxu0 %v242_v17  ;;  %v552_v13 = vld [vmem:[%s2201_s6 + $0x138] sm:$0xff]  ;;  %v573_v14 = vld [vmem:[%s2201_s6 + $0x1e0] sm:$0xff]  ;;  %v535_v17 = vld [vmem:[%s2201_s6 + $0xb0] sm:$0xff] }
  0x31   :  { %424 = vmatpush.msra.mxu1 %v382_v18  ;;  %447 = vmatpush.msra.mxu2 %v383_v19  ;;  %v551_v18 = vld [vmem:[%s2201_s6 + $0x130] sm:$0xff]  ;;  %v572_v19 = vld [vmem:[%s2201_s6 + $0x1d8] sm:$0xff] }
  0x32   :  { %356 = vmatpush.msra.mxu0 %v238_v20  ;;  %470 = vmatpush.msra.mxu3 %v384_v21  ;;  %v515_v20 = vld [vmem:[%s2201_s6 + $0x10] sm:$0xff]  ;;  %v534_v21 = vld [vmem:[%s2201_s6 + $0xa8] sm:$0xff] }
  0x33   :  { %425 = vmatpush.msra.mxu1 %v378_v22  ;;  %448 = vmatpush.msra.mxu2 %v379_v23  ;;  %v550_v22 = vld [vmem:[%s2201_s6 + $0x128] sm:$0xff]  ;;  %v571_v23 = vld [vmem:[%s2201_s6 + $0x1d0] sm:$0xff] }
  0x34   :  { %357 = vmatpush.msra.mxu0 %v234_v24  ;;  %471 = vmatpush.msra.mxu3 %v380_v25  ;;  %v514_v24 = vld [vmem:[%s2201_s6 + $0x8] sm:$0xff]  ;;  %v533_v25 = vld [vmem:[%s2201_s6 + $0xa0] sm:$0xff] }
  0x35   :  { %426 = vmatpush.msra.mxu1 %v374_v26  ;;  %449 = vmatpush.msra.mxu2 %v375_v27  ;;  %v549_v26 = vld [vmem:[%s2201_s6 + $0x120] sm:$0xff]  ;;  %v570_v27 = vld [vmem:[%s2201_s6 + $0x1c8] sm:$0xff] }
  0x36   :  { %358 = vmatpush.msra.mxu0 %v230_v28  ;;  %472 = vmatpush.msra.mxu3 %v376_v29  ;;  %v513_v28 = vld [vmem:[%s2201_s6] sm:$0xff]  ;;  %v532_v29 = vld [vmem:[%s2201_s6 + $0x98] sm:$0xff] }
  0x37   :  { %1113 = vmatmul.msk.f32.vlgmr.msra.gmra.mxu0 %vm105_vm0, %v1432_v2  ;;  %427 = vmatpush.msra.mxu1 %v370_v30  ;;  %v576_v2 = vld [vmem:[%s2201_s6 + $0x1f8] sm:$0xff] }
  0x38   :  { %490 = vmatpush.msrb.mxu0 %v397_v31  ;;  %450 = vmatpush.msra.mxu2 %v371_v32  ;;  %v548_v30 = vld [vmem:[%s2201_s6 + $0x118] sm:$0xff]  ;;  %v569_v31 = vld [vmem:[%s2201_s6 + $0x1c0] sm:$0xff]  ;;  %v531_v32 = vld [vmem:[%s2201_s6 + $0x90] sm:$0xff] }
  0x39   :  { %428 = vmatpush.msra.mxu1 %v366_v33  ;;  %473 = vmatpush.msra.mxu3 %v372_v34  ;;  %v547_v33 = vld [vmem:[%s2201_s6 + $0x110] sm:$0xff]  ;;  %v568_v34 = vld [vmem:[%s2201_s6 + $0x1b8] sm:$0xff] }
  0x3a   :  { %491 = vmatpush.msrb.mxu0 %v393_v36  ;;  %451 = vmatpush.msra.mxu2 %v367_v37  ;;  %v546_v36 = vld [vmem:[%s2201_s6 + $0x108] sm:$0xff]  ;;  %v567_v37 = vld [vmem:[%s2201_s6 + $0x1b0] sm:$0xff] }
  0x3b   :  { %577 = vmatpush.msrb.mxu1 %v528_v35  ;;  %474 = vmatpush.msra.mxu3 %v368_v38  ;;  %v530_v35 = vld [vmem:[%s2201_s6 + $0x88] sm:$0xff]  ;;  %v529_v38 = vld [vmem:[%s2201_s6 + $0x80] sm:$0xff] }
  0x3c   :  { %492 = vmatpush.msrb.mxu0 %v389_v40  ;;  %600 = vmatpush.msrb.mxu2 %v544_v41  ;;  %v566_v40 = vld [vmem:[%s2201_s6 + $0x1a8] sm:$0xff] }
  0x3d   :  { %578 = vmatpush.msrb.mxu1 %v527_v39  ;;  %623 = vmatpush.msrb.mxu3 %v560_v42  ;;  %v545_v39 = vld [vmem:[%s2201_s6 + $0x100] sm:$0xff] }
  0x3e   :  { %493 = vmatpush.msrb.mxu0 %v385_v44  ;;  %601 = vmatpush.msrb.mxu2 %v543_v45  ;;  %v564_v44 = vld [vmem:[%s2201_s6 + $0x198] sm:$0xff]  ;;  %v563_v45 = vld [vmem:[%s2201_s6 + $0x190] sm:$0xff] }
  0x3f   :  { %579 = vmatpush.msrb.mxu1 %v526_v43  ;;  %1114 = vmatmul.msk.f32.gmra.mxu0 %vm105_vm0, %v1484_v16  ;;  %v516_v16 = vld [vmem:[%s2201_s6 + $0x18] sm:$0xff]  ;;  %v565_v43 = vld [vmem:[%s2201_s6 + $0x1a0] sm:$0xff] }
  0x40   :  { %624 = vmatpush.msrb.mxu3 %v559_v47  ;;  %494 = vmatpush.msrb.mxu0 %v381_v48  ;;  %v562_v48 = vld [vmem:[%s2201_s6 + $0x188] sm:$0xff] }
  0x41   :  { %580 = vmatpush.msrb.mxu1 %v525_v46  ;;  %602 = vmatpush.msrb.mxu2 %v542_v51  ;;  %v39_v51 = vld [vmem:[%s2203_s10] ss:$8 sm:$0x10] }
  0x42   :  { %625 = vmatpush.msrb.mxu3 %v558_v52  ;;  %495 = vmatpush.msrb.mxu0 %v377_v53 }
  0x43   :  { %581 = vmatpush.msrb.mxu1 %v524_v49  ;;  %603 = vmatpush.msrb.mxu2 %v541_v55  ;;  %v561_v49 = vld [vmem:[%s2201_s6 + $0x180] sm:$0xff] }
  0x44   :  { %626 = vmatpush.msrb.mxu3 %v557_v56  ;;  %496 = vmatpush.msrb.mxu0 %v373_v57  ;;  %v1095_v55 = vld [vmem:[%s2203_s10 + $0x1] ss:$8 sm:$0xf] }
  0x45   :  { %582 = vmatpush.msrb.mxu1 %v523_v50  ;;  %604 = vmatpush.msrb.mxu2 %v540_v59  ;;  %v38_v50 = vld [vmem:[%s2203_s10] ss:$8 sm:$0xf]  ;;  %v260_v59 = vperm.slane %v1095_v55, 0 }
  0x46   :  { %627 = vmatpush.msrb.mxu3 %v556_v60  ;;  %1115 = vmatmul.msk.f32.vlgmr.msra.gmra.mxu1 %vm105_vm0, %v52_v61 }
  0x47   :  { %583 = vmatpush.msrb.mxu1 %v522_v54  ;;  %497 = vmatpush.msrb.mxu0 %v369_v62  ;;  %v1791_v54 = vor.u32 %v39_v51, %v38_v50 }
  0x48   :  { %1117 = vmatmul.msk.f32.vlgmr.msra.gmra.mxu2 %vm105_vm0, %v52_v61  ;;  %628 = vmatpush.msrb.mxu3 %v555_v1 }
  0x49   :  { %584 = vmatpush.msrb.mxu1 %v521_v58  ;;  %605 = vmatpush.msrb.mxu2 %v539_v0  ;;  %v95_v56 = vperm.slane %v1791_v54, 0  ;;  %v96_v1 = vperm.slane %v1791_v54, 1 }
  0x4a   :  { %646 = vmatpush.msra.mxu0 %v576_v2  ;;  %1119 = vmatmul.msk.f32.vlgmr.msra.gmra.mxu3 %vm105_vm0, %v52_v61  ;;  %v97_v2 = vperm.slane %v1791_v54, 2 }
  0x4b   :  { %585 = vmatpush.msrb.mxu1 %v520_v63  ;;  %1121 = vmatmul.msk.f32.vlgmr.msrb.gmra.mxu0 %vm105_vm0, %v52_v61 }
  0x4c   :  { %606 = vmatpush.msrb.mxu2 %v538_v4  ;;  %629 = vmatpush.msrb.mxu3 %v554_v5  ;;  %v262_v4 = vperm.slane %v1095_v55, 2 }
  0x4d   :  { %586 = vmatpush.msrb.mxu1 %v519_v3  ;;  %647 = vmatpush.msra.mxu0 %v575_v6  ;;  %v261_v3 = vperm.slane %v1095_v55, 1 }
  0x4e   :  { %607 = vmatpush.msrb.mxu2 %v537_v8  ;;  %630 = vmatpush.msrb.mxu3 %v553_v9 }
  0x4f   :  { %587 = vmatpush.msrb.mxu1 %v518_v7  ;;  %648 = vmatpush.msra.mxu0 %v574_v10 }
  0x50   :  { %608 = vmatpush.msrb.mxu2 %v536_v12  ;;  %631 = vmatpush.msrb.mxu3 %v552_v13 }
  0x51   :  { %588 = vmatpush.msrb.mxu1 %v517_v11  ;;  %649 = vmatpush.msra.mxu0 %v573_v14 }
  0x52   :  { %1116 = vmatmul.msk.f32.gmra.mxu1 %vm105_vm0, %v53_v15  ;;  %1118 = vmatmul.msk.f32.gmra.mxu2 %vm105_vm0, %v53_v15 }
  0x53   :  { %589 = vmatpush.msrb.mxu1 %v516_v16  ;;  %609 = vmatpush.msrb.mxu2 %v535_v17 }
  0x54   :  { %632 = vmatpush.msrb.mxu3 %v551_v18  ;;  %650 = vmatpush.msra.mxu0 %v572_v19  ;;  %v98_v18 = vperm.slane %v1791_v54, 3  ;;  %v263_v19 = vperm.slane %v1095_v55, 3 }
  0x55   :  { %1120 = vmatmul.msk.f32.gmra.mxu3 %vm105_vm0, %v53_v15  ;;  %1122 = vmatmul.msk.f32.gmra.mxu0 %vm105_vm0, %v53_v15 }
  0x56   :  { %590 = vmatpush.msrb.mxu1 %v515_v20  ;;  %610 = vmatpush.msrb.mxu2 %v534_v21 }
  0x57   :  { %633 = vmatpush.msrb.mxu3 %v550_v22  ;;  %651 = vmatpush.msra.mxu0 %v571_v23 }
  0x58   :  { %591 = vmatpush.msrb.mxu1 %v514_v24  ;;  %611 = vmatpush.msrb.mxu2 %v533_v25 }
  0x59   :  { %634 = vmatpush.msrb.mxu3 %v549_v26  ;;  %652 = vmatpush.msra.mxu0 %v570_v27 }
  0x5a   :  { %592 = vmatpush.msrb.mxu1 %v513_v28  ;;  %612 = vmatpush.msrb.mxu2 %v532_v29 }
  0x5b   :  { %635 = vmatpush.msrb.mxu3 %v548_v30  ;;  %653 = vmatpush.msra.mxu0 %v569_v31 }
  0x5c   :  { %613 = vmatpush.msrb.mxu2 %v531_v32 }
  0x5d   :  { %636 = vmatpush.msrb.mxu3 %v547_v33  ;;  %654 = vmatpush.msra.mxu0 %v568_v34 }
  0x5e   :  { %614 = vmatpush.msrb.mxu2 %v530_v35 }
  0x5f   :  { %637 = vmatpush.msrb.mxu3 %v546_v36  ;;  %655 = vmatpush.msra.mxu0 %v567_v37 }
  0x60   :  { %615 = vmatpush.msrb.mxu2 %v529_v38 }
  0x61   :  { %638 = vmatpush.msrb.mxu3 %v545_v39  ;;  %656 = vmatpush.msra.mxu0 %v566_v40  ;;  %v688_v40 = vld [vmem:[%s2204_s7 + $0x38] sm:$0xff] }
  0x62   :  { %703 = vmatpush.msra.mxu1 %v688_v40  ;;  %v739_v40 = vld [vmem:[%s2205_s8 + $0x48] sm:$0xff] }
  0x63   :  { %657 = vmatpush.msra.mxu0 %v565_v43 }
  0x65   :  { %658 = vmatpush.msra.mxu0 %v564_v44 }
  0x67   :  { %659 = vmatpush.msra.mxu0 %v563_v45 }
  0x69   :  { %660 = vmatpush.msra.mxu0 %v562_v48 }
  0x6b   :  { %661 = vmatpush.msra.mxu0 %v561_v49 }
  0x8f   :  { %v129_v41 = vpop.f32.mrf.mxu0  ;;  %v152_v42 = vpop.f32.mrf.mxu1 }
  0x90   :  { %v130_v62 = vadd.f32 %v129_v41, %v95_v56  ;;  %v153_v7 = vadd.f32 %v152_v42, %v96_v1  ;;  %v687_v41 = vld [vmem:[%s2204_s7 + $0x30] sm:$0xff]  ;;  %v686_v42 = vld [vmem:[%s2204_s7 + $0x28] sm:$0xff] }
  0x91   :  { %704 = vmatpush.msra.mxu1 %v687_v41  ;;  %v740_v41 = vld [vmem:[%s2205_s8 + $0x50] sm:$0xff] }
  0x93   :  { %705 = vmatpush.msra.mxu1 %v686_v42  ;;  %v741_v42 = vld [vmem:[%s2205_s8 + $0x58] sm:$0xff] }
  0x96   :  { %v175_v46 = vpop.f32.mrf.mxu2  ;;  %v198_v47 = vpop.f32.mrf.mxu3 }
  0x97   :  { %v176_v8 = vadd.f32 %v175_v46, %v97_v2  ;;  %v199_v27 = vadd.f32 %v198_v47, %v98_v18 }
  0x99   :  { %v132_v52 = vpop.f32.mrf.mxu0  ;;  %v155_v53 = vpop.f32.mrf.mxu1 }
  0x9a   :  { %v133_v12 = vadd.f32 %v132_v52, %v95_v56  ;;  %v156_v21 = vadd.f32 %v155_v53, %v96_v1  ;;  %v685_v1 = vld [vmem:[%s2204_s7 + $0x20] sm:$0xff] }
  0x9b   :  { %706 = vmatpush.msra.mxu1 %v685_v1  ;;  %v882_v1 = vld [vmem:[%s2206_s9 + $0x70] sm:$0xff] }
  0xa0   :  { %v178_v57 = vpop.f32.mrf.mxu2  ;;  %v201_v58 = vpop.f32.mrf.mxu3 }
  0xa1   :  { %v179_v24 = vadd.f32 %v178_v57, %v97_v2  ;;  %v202_v33 = vadd.f32 %v201_v58, %v98_v18  ;;  %v684_v2 = vld [vmem:[%s2204_s7 + $0x18] sm:$0xff] }
  0xa2   :  { %707 = vmatpush.msra.mxu1 %v684_v2  ;;  %v761_v18 = vld [vmem:[%s2205_s8 + $0xf8] sm:$0xff]  ;;  %v898_v2 = vld [vmem:[%s2206_s9 + $0xf0] sm:$0xff] }
  0xa3   :  { %v1797_v60 = vpop.f32.mrf.mxu0  ;;  %v291_v61 = vpop.f32.mrf.mxu1 }
  0xa4   :  { %v292_v63 = vadd.f32 %v291_v61, %v260_v59 }
  0xa6   :  { %v505_v0 = vmul.f32 %v292_v63, %v130_v62 }
  0xa8   :  { %593 = vmatmul.f32.vlgmr.msrb.gmra.mxu1 %v505_v0 }
  0xaa   :  { %v314_v5 = vpop.f32.mrf.mxu2  ;;  %v337_v6 = vpop.f32.mrf.mxu3 }
  0xab   :  { %v315_v9 = vadd.f32 %v314_v5, %v261_v3  ;;  %v338_v10 = vadd.f32 %v337_v6, %v262_v4  ;;  %v294_v11 = vpop.f32.mrf.mxu1  ;;  %v681_v5 = vld [vmem:[%s2204_s7] sm:$0xff] }
  0xac   :  { %v1801_v13 = vpop.f32.mrf.mxu0  ;;  %v295_v14 = vadd.f32 %v294_v11, %v260_v59 }
  0xad   :  { %v506_v15 = vmul.f32 %v315_v9, %v153_v7  ;;  %v507_v16 = vmul.f32 %v338_v10, %v176_v8 }
  0xae   :  { %v509_v17 = vmul.f32 %v295_v14, %v133_v12 }
  0xaf   :  { %616 = vmatmul.f32.vlgmr.msrb.gmra.mxu2 %v506_v15  ;;  %639 = vmatmul.f32.vlgmr.msrb.gmra.mxu3 %v507_v16  ;;  %v758_v15 = vld [vmem:[%s2205_s8 + $0xe0] sm:$0xff]  ;;  %v759_v16 = vld [vmem:[%s2205_s8 + $0xe8] sm:$0xff] }
  0xb0   :  { %596 = vmatmul.f32.gmra.mxu1 %v509_v17  ;;  %v760_v17 = vld [vmem:[%s2205_s8 + $0xf0] sm:$0xff]  ;;  %776 = vmatpush.msra.mxu2 %v758_v15  ;;  %v896_v15 = vld [vmem:[%s2206_s9 + $0xe0] sm:$0xff] }
  0xb1   :  { %799 = vmatpush.msra.mxu3 %v759_v16  ;;  %822 = vmatpush.msrb.mxu0 %v760_v17  ;;  %v910_v16 = vld [vmem:[%s2206_s9 + $0x150] sm:$0xff] }
  0xb2   :  { %v317_v20 = vpop.f32.mrf.mxu2  ;;  %v926_v17 = vld [vmem:[%s2206_s9 + $0x1d0] sm:$0xff] }
  0xb3   :  { %v318_v22 = vadd.f32 %v317_v20, %v261_v3  ;;  %v340_v23 = vpop.f32.mrf.mxu3  ;;  %v683_v3 = vld [vmem:[%s2204_s7 + $0x10] sm:$0xff]  ;;  %v755_v20 = vld [vmem:[%s2205_s8 + $0xc8] sm:$0xff] }
  0xb4   :  { %v341_v25 = vadd.f32 %v340_v23, %v262_v4  ;;  %v360_v26 = vpop.f32.mrf.mxu0  ;;  %v682_v4 = vld [vmem:[%s2204_s7 + $0x8] sm:$0xff]  ;;  %708 = vmatpush.msra.mxu1 %v683_v3  ;;  %800 = vmatpush.msra.mxu3 %v755_v20  ;;  %v750_v23 = vld [vmem:[%s2205_s8 + $0xa0] sm:$0xff] }
  0xb5   :  { %v361_v28 = vadd.f32 %v360_v26, %v263_v19  ;;  %v510_v29 = vmul.f32 %v318_v22, %v156_v21  ;;  %v756_v21 = vld [vmem:[%s2205_s8 + $0xd0] sm:$0xff]  ;;  %v757_v22 = vld [vmem:[%s2205_s8 + $0xd8] sm:$0xff]  ;;  %v909_v20 = vld [vmem:[%s2206_s9 + $0x148] sm:$0xff] }
  0xb6   :  { %v511_v30 = vmul.f32 %v341_v25, %v179_v24  ;;  %709 = vmatpush.msra.mxu1 %v682_v4  ;;  %823 = vmatpush.msrb.mxu0 %v756_v21  ;;  %v751_v24 = vld [vmem:[%s2205_s8 + $0xa8] sm:$0xff]  ;;  %v752_v25 = vld [vmem:[%s2205_s8 + $0xb0] sm:$0xff]  ;;  %v753_v26 = vld [vmem:[%s2205_s8 + $0xb8] sm:$0xff] }
  0xb7   :  { %v508_v31 = vmul.f32 %v361_v28, %v199_v27  ;;  %619 = vmatmul.f32.gmra.mxu2 %v510_v29  ;;  %801 = vmatpush.msra.mxu3 %v751_v24  ;;  %v746_v27 = vld [vmem:[%s2205_s8 + $0x80] sm:$0xff]  ;;  %v747_v28 = vld [vmem:[%s2205_s8 + $0x88] sm:$0xff]  ;;  %v748_v29 = vld [vmem:[%s2205_s8 + $0x90] sm:$0xff] }
  0xb8   :  { %642 = vmatmul.f32.gmra.mxu3 %v511_v30  ;;  %710 = vmatpush.msra.mxu1 %v681_v5  ;;  %v749_v30 = vld [vmem:[%s2205_s8 + $0x98] sm:$0xff]  ;;  %v912_v4 = vld [vmem:[%s2206_s9 + $0x160] sm:$0xff]  ;;  %v925_v21 = vld [vmem:[%s2206_s9 + $0x1c8] sm:$0xff] }
  0xb9   :  { %662 = vmatmul.f32.vlgmr.msra.gmra.mxu0 %v508_v31  ;;  %802 = vmatpush.msra.mxu3 %v747_v28  ;;  %v742_v31 = vld [vmem:[%s2205_s8 + $0x60] sm:$0xff] }
  0xba   :  { %845 = vmatpush.msrb.mxu1 %v761_v18  ;;  %824 = vmatpush.msrb.mxu0 %v752_v25  ;;  %v928_v5 = vld [vmem:[%s2206_s9 + $0x1e0] sm:$0xff]  ;;  %v879_v18 = vld [vmem:[%s2206_s9 + $0x58] sm:$0xff] }
  0xbb   :  { %v908_v25 = vld [vmem:[%s2206_s9 + $0x140] sm:$0xff] }
  0xbc   :  { %v363_v32 = vpop.f32.mrf.mxu0  ;;  %846 = vmatpush.msrb.mxu1 %v757_v22  ;;  %825 = vmatpush.msrb.mxu0 %v748_v29  ;;  %v878_v22 = vld [vmem:[%s2206_s9 + $0x50] sm:$0xff] }
  0xbd   :  { %v364_v34 = vadd.f32 %v363_v32, %v263_v19  ;;  %v754_v19 = vld [vmem:[%s2205_s8 + $0xc0] sm:$0xff]  ;;  %v743_v32 = vld [vmem:[%s2205_s8 + $0x68] sm:$0xff] }
  0xbe   :  { %777 = vmatpush.msra.mxu2 %v754_v19  ;;  %847 = vmatpush.msrb.mxu1 %v753_v26  ;;  %v895_v19 = vld [vmem:[%s2206_s9 + $0xd8] sm:$0xff]  ;;  %v924_v26 = vld [vmem:[%s2206_s9 + $0x1c0] sm:$0xff] }
  0xbf   :  { %v512_v35 = vmul.f32 %v364_v34, %v202_v33  ;;  %v744_v33 = vld [vmem:[%s2205_s8 + $0x70] sm:$0xff]  ;;  %803 = vmatpush.msra.mxu3 %v743_v32  ;;  %v745_v34 = vld [vmem:[%s2205_s8 + $0x78] sm:$0xff] }
  0xc0   :  { %778 = vmatpush.msra.mxu2 %v750_v23  ;;  %848 = vmatpush.msrb.mxu1 %v749_v30  ;;  %v894_v23 = vld [vmem:[%s2206_s9 + $0xd0] sm:$0xff]  ;;  %v907_v30 = vld [vmem:[%s2206_s9 + $0x138] sm:$0xff] }
  0xc1   :  { %665 = vmatmul.f32.gmra.mxu0 %v512_v35  ;;  %v738_v35 = vld [vmem:[%s2205_s8 + $0x40] sm:$0xff]  ;;  %804 = vmatpush.msra.mxu3 %v739_v40 }
  0xc2   :  { %779 = vmatpush.msra.mxu2 %v746_v27  ;;  %826 = vmatpush.msrb.mxu0 %v744_v33 }
  0xc3   :  { %v1804_v36 = vpop.f32.mrf.mxu1  ;;  %849 = vmatpush.msrb.mxu1 %v745_v34 }
  0xc4   :  { %780 = vmatpush.msra.mxu2 %v742_v31  ;;  %827 = vmatpush.msrb.mxu0 %v740_v41  ;;  %v923_v31 = vld [vmem:[%s2206_s9 + $0x1b8] sm:$0xff] }
  0xc5   :  { %850 = vmatpush.msrb.mxu1 %v741_v42 }
  0xc6   :  { %781 = vmatpush.msra.mxu2 %v738_v35 }
  0xc8   :  { %v1810_v39 = vpop.f32.mrf.mxu0 }
  0xcb   :  { %v1806_v37 = vpop.f32.mrf.mxu2 }
  0xcd   :  { %v1808_v38 = vpop.f32.mrf.mxu3 }
  0xcf   :  { %v1821_v43 = vpop.f32.mrf.mxu1 }
  0xd2   :  { %v1827_v46 = vpop.f32.mrf.mxu0 }
  0xd5   :  { %v1823_v44 = vpop.f32.mrf.mxu2 }
  0xd8   :  { %v1825_v45 = vpop.f32.mrf.mxu3 }
 0x125   :  { %v594_v47 = vpop.f32.mrf.mxu1 }
 0x12d   :  { %v597_v56 = vpop.f32.mrf.mxu1 }
 0x132   :  { %v617_v48 = vpop.f32.mrf.mxu2  ;;  %v640_v49 = vpop.f32.mrf.mxu3 }
 0x133   :  { %v618_v50 = vadd.f32 %v617_v48, %v594_v47  ;;  %v734_v47 = vld [vmem:[%s2205_s8 + $0x20] sm:$0xff]  ;;  %v735_v48 = vld [vmem:[%s2205_s8 + $0x28] sm:$0xff] }
 0x134   :  { %782 = vmatpush.msra.mxu2 %v734_v47  ;;  %805 = vmatpush.msra.mxu3 %v735_v48  ;;  %v906_v48 = vld [vmem:[%s2206_s9 + $0x130] sm:$0xff] }
 0x135   :  { %v641_v51 = vadd.f32 %v640_v49, %v618_v50  ;;  %v736_v49 = vld [vmem:[%s2205_s8 + $0x30] sm:$0xff]  ;;  %v737_v50 = vld [vmem:[%s2205_s8 + $0x38] sm:$0xff] }
 0x136   :  { %v663_v52 = vpop.f32.mrf.mxu0  ;;  %828 = vmatpush.msrb.mxu0 %v736_v49  ;;  %851 = vmatpush.msrb.mxu1 %v737_v50  ;;  %v922_v49 = vld [vmem:[%s2206_s9 + $0x1b0] sm:$0xff]  ;;  %v876_v50 = vld [vmem:[%s2206_s9 + $0x40] sm:$0xff] }
 0x137   :  { %v664_v53 = vadd.f32 %v663_v52, %v641_v51  ;;  %v730_v51 = vld [vmem:[%s2205_s8] sm:$0xff]  ;;  %v731_v52 = vld [vmem:[%s2205_s8 + $0x8] sm:$0xff] }
 0x138   :  { %783 = vmatpush.msra.mxu2 %v730_v51  ;;  %806 = vmatpush.msra.mxu3 %v731_v52  ;;  %v892_v51 = vld [vmem:[%s2206_s9 + $0xc0] sm:$0xff]  ;;  %v905_v52 = vld [vmem:[%s2206_s9 + $0x128] sm:$0xff] }
 0x139   :  { %v669_v55 = vsel %vm105_vm0, %v664_v53, -inf }
 0x13a   :  { %v620_v57 = vpop.f32.mrf.mxu2  ;;  %670 = vmax.xlane.f32.xlu0 %v669_v55  ;;  %v733_v55 = vld [vmem:[%s2205_s8 + $0x18] sm:$0xff] }
 0x13b   :  { %v621_v58 = vadd.f32 %v620_v57, %v597_v56  ;;  %v643_v59 = vpop.f32.mrf.mxu3  ;;  %852 = vmatpush.msrb.mxu1 %v733_v55  ;;  %v915_v56 = vld [vmem:[%s2206_s9 + $0x178] sm:$0xff] }
 0x13c   :  { %v931_v57 = vld [vmem:[%s2206_s9 + $0x1f8] sm:$0xff] }
 0x13d   :  { %v644_v61 = vadd.f32 %v643_v59, %v621_v58  ;;  %v914_v58 = vld [vmem:[%s2206_s9 + $0x170] sm:$0xff]  ;;  %v875_v55 = vld [vmem:[%s2206_s9 + $0x38] sm:$0xff] }
 0x13e   :  { %v666_v62 = vpop.f32.mrf.mxu0  ;;  %v930_v59 = vld [vmem:[%s2206_s9 + $0x1f0] sm:$0xff] }
 0x13f   :  { %v667_v63 = vadd.f32 %v666_v62, %v644_v61  ;;  %v913_v61 = vld [vmem:[%s2206_s9 + $0x168] sm:$0xff] }
 0x140   :  { %v929_v62 = vld [vmem:[%s2206_s9 + $0x1e8] sm:$0xff] }
 0x141   :  { %v672_v0 = vsel %vm105_vm0, %v667_v63, -inf }
 0x142   :  { %673 = vmax.xlane.f32.xlu0 %v672_v0  ;;  %v899_v0 = vld [vmem:[%s2206_s9 + $0xf8] sm:$0xff] }
 0x143   :  { %955 = vmatpush.msrb.mxu3 %v899_v0  ;;  %v873_v0 = vld [vmem:[%s2206_s9 + $0x28] sm:$0xff] }
 0x145   :  { %956 = vmatpush.msrb.mxu3 %v898_v2  ;;  %v902_v2 = vld [vmem:[%s2206_s9 + $0x110] sm:$0xff] }
 0x1ad   :  { %v671_v6 = vpop.xlane.xlu0 %670 }
 0x1ae   :  { %v675_v7 = vsub.f32 %v664_v53, %v671_v6  ;;  %v732_v53 = vld [vmem:[%s2205_s8 + $0x10] sm:$0xff] }
 0x1af   :  { %829 = vmatpush.msrb.mxu0 %v732_v53  ;;  %v921_v53 = vld [vmem:[%s2206_s9 + $0x1a8] sm:$0xff] }
 0x1b0   :  { %v677_v8 = vmul.f32 1.442695, %v675_v7  ;;  %v881_v7 = vld [vmem:[%s2206_s9 + $0x68] sm:$0xff] }
 0x1b1   :  { %978 = vmatpush.msra.mxu0 %v915_v56  ;;  %v891_v56 = vld [vmem:[%s2206_s9 + $0xb8] sm:$0xff] }
 0x1b2   :  { %1135 = vpow2.f32 %v677_v8  ;;  %v897_v8 = vld [vmem:[%s2206_s9 + $0xe8] sm:$0xff] }
 0x1b3   :  { %979 = vmatpush.msra.mxu0 %v914_v58  ;;  %957 = vmatpush.msrb.mxu3 %v897_v8  ;;  %v920_v58 = vld [vmem:[%s2206_s9 + $0x1a0] sm:$0xff]  ;;  %v871_v8 = vld [vmem:[%s2206_s9 + $0x18] sm:$0xff] }
 0x1b5   :  { %v674_v9 = vpop.xlane.xlu0 %673  ;;  %980 = vmatpush.msra.mxu0 %v913_v61  ;;  %958 = vmatpush.msrb.mxu3 %v896_v15  ;;  %v890_v61 = vld [vmem:[%s2206_s9 + $0xb0] sm:$0xff] }
 0x1b6   :  { %v676_v10 = vsub.f32 %v667_v63, %v674_v9  ;;  %v883_v63 = vld [vmem:[%s2206_s9 + $0x78] sm:$0xff]  ;;  %v870_v15 = vld [vmem:[%s2206_s9 + $0x10] sm:$0xff] }
 0x1b7   :  { %932 = vmatpush.msrb.mxu2 %v883_v63  ;;  %v911_v9 = vld [vmem:[%s2206_s9 + $0x158] sm:$0xff]  ;;  %981 = vmatpush.msra.mxu0 %v912_v4  ;;  %v872_v4 = vld [vmem:[%s2206_s9 + $0x20] sm:$0xff] }
 0x1b8   :  { %v1846_v11 = vpop.eup %1135  ;;  %v679_v12 = vmul.f32 1.442695, %v676_v10  ;;  %v927_v10 = vld [vmem:[%s2206_s9 + $0x1d8] sm:$0xff]  ;;  %959 = vmatpush.msrb.mxu3 %v895_v19  ;;  %v868_v19 = vld [vmem:[%s2206_s9] sm:$0xff] }
 0x1b9   :  { %1123 = vmatmul.msk.f32.vlgmr.msra.gmra.mxu1 %vm105_vm0, %v1846_v11  ;;  %933 = vmatpush.msrb.mxu2 %v882_v1  ;;  %v919_v63 = vld [vmem:[%s2206_s9 + $0x198] sm:$0xff]  ;;  %v889_v1 = vld [vmem:[%s2206_s9 + $0xa8] sm:$0xff] }
 0x1ba   :  { %1137 = vpow2.f32 %v679_v12  ;;  %1001 = vmatpush.msra.mxu1 %v931_v57  ;;  %v880_v12 = vld [vmem:[%s2206_s9 + $0x60] sm:$0xff]  ;;  %982 = vmatpush.msra.mxu0 %v911_v9  ;;  %v887_v9 = vld [vmem:[%s2206_s9 + $0x98] sm:$0xff] }
 0x1bb   :  { %934 = vmatpush.msrb.mxu2 %v881_v7  ;;  %960 = vmatpush.msrb.mxu3 %v894_v23  ;;  %v904_v57 = vld [vmem:[%s2206_s9 + $0x120] sm:$0xff]  ;;  %v917_v7 = vld [vmem:[%s2206_s9 + $0x188] sm:$0xff] }
 0x1bc   :  { %1002 = vmatpush.msra.mxu1 %v930_v59  ;;  %983 = vmatpush.msra.mxu0 %v910_v16  ;;  %v874_v59 = vld [vmem:[%s2206_s9 + $0x30] sm:$0xff] }
 0x1bd   :  { %935 = vmatpush.msrb.mxu2 %v880_v12  ;;  %v916_v12 = vld [vmem:[%s2206_s9 + $0x180] sm:$0xff]  ;;  %v886_v16 = vld [vmem:[%s2206_s9 + $0x90] sm:$0xff] }
 0x1be   :  { %1003 = vmatpush.msra.mxu1 %v929_v62  ;;  %984 = vmatpush.msra.mxu0 %v909_v20  ;;  %v903_v62 = vld [vmem:[%s2206_s9 + $0x118] sm:$0xff]  ;;  %v884_v20 = vld [vmem:[%s2206_s9 + $0x80] sm:$0xff] }
 0x1bf   :  { %936 = vmatpush.msrb.mxu2 %v879_v18  ;;  %v885_v18 = vld [vmem:[%s2206_s9 + $0x88] sm:$0xff] }
 0x1c0   :  { %v1850_v14 = vpop.eup %1137  ;;  %1004 = vmatpush.msra.mxu1 %v928_v5  ;;  %985 = vmatpush.msra.mxu0 %v908_v25  ;;  %v888_v5 = vld [vmem:[%s2206_s9 + $0xa0] sm:$0xff] }
 0x1c1   :  { %1124 = vmatmul.msk.f32.gmra.mxu1 %vm105_vm0, %v1850_v14  ;;  %937 = vmatpush.msrb.mxu2 %v878_v22 }
 0x1c2   :  { %1005 = vmatpush.msra.mxu1 %v927_v10  ;;  %986 = vmatpush.msra.mxu0 %v907_v30  ;;  %v900_v10 = vld [vmem:[%s2206_s9 + $0x100] sm:$0xff] }
 0x1c4   :  { %1006 = vmatpush.msra.mxu1 %v926_v17  ;;  %987 = vmatpush.msra.mxu0 %v906_v48  ;;  %v869_v17 = vld [vmem:[%s2206_s9 + $0x8] sm:$0xff] }
 0x1c6   :  { %1007 = vmatpush.msra.mxu1 %v925_v21  ;;  %988 = vmatpush.msra.mxu0 %v905_v52  ;;  %v1096_v21 = vld [vmem:[%s2203_s10 + $0x2] ss:$8 sm:$0xf] }
 0x1c7   :  { %v401_v22 = vperm.slane %v1096_v21, 2  ;;  %v402_v23 = vperm.slane %v1096_v21, 3  ;;  %v399_v25 = vperm.slane %v1096_v21, 0 }
 0x1c8   :  { %1008 = vmatpush.msra.mxu1 %v924_v26  ;;  %989 = vmatpush.msra.mxu0 %v904_v57  ;;  %v400_v26 = vperm.slane %v1096_v21, 1  ;;  %v99_v57 = vperm.slane %v1791_v54, 4 }
 0x1ca   :  { %1009 = vmatpush.msra.mxu1 %v923_v31  ;;  %990 = vmatpush.msra.mxu0 %v903_v62 }
 0x1cc   :  { %1010 = vmatpush.msra.mxu1 %v922_v49  ;;  %991 = vmatpush.msra.mxu0 %v902_v2 }
 0x1ce   :  { %1011 = vmatpush.msra.mxu1 %v921_v53 }
 0x1d0   :  { %1012 = vmatpush.msra.mxu1 %v920_v58 }
 0x1d2   :  { %1013 = vmatpush.msra.mxu1 %v919_v63 }
 0x236   :  { %v712_v3 = vpop.f32.mrf.mxu1 }
 0x237   :  { %v718_v6 = vmax.f32 %v712_v3, 1e-37  ;;  %v918_v3 = vld [vmem:[%s2206_s9 + $0x190] sm:$0xff] }
 0x238   :  { %1014 = vmatpush.msra.mxu1 %v918_v3 }
 0x239   :  { %1139 = vrcp.f32 %v718_v6 }
 0x23a   :  { %1015 = vmatpush.msra.mxu1 %v917_v7  ;;  %v225_v7 = vadd.f32 %v1801_v13, %v99_v57 }
 0x23c   :  { %1016 = vmatpush.msra.mxu1 %v916_v12 }
 0x23e   :  { %v715_v24 = vpop.f32.mrf.mxu1 }
 0x23f   :  { %v1140_v27 = vpop.eup %1139  ;;  %v719_v28 = vmax.f32 %v715_v24, 1e-37  ;;  %v477_v24 = vadd.f32 %v1808_v38, %v401_v22  ;;  %v480_v38 = vadd.f32 %v1825_v45, %v401_v22  ;;  %v45_v45 = vld [vmem:[%s2203_s10 + $0x3] ss:$0 sm:$0xff] }
 0x240   :  { %v722_v29 = vmul.f32 %v1140_v27, %v718_v6  ;;  %v901_v6 = vld [vmem:[%s2206_s9 + $0x108] sm:$0xff] }
 0x241   :  { %1141 = vrcp.f32 %v719_v28  ;;  %992 = vmatpush.msra.mxu0 %v901_v6 }
 0x242   :  { %v724_v32 = vsub.f32 2.0, %v722_v29 }
 0x243   :  { %993 = vmatpush.msra.mxu0 %v900_v10 }
 0x244   :  { %v726_v33 = vmul.f32 %v1140_v27, %v724_v32  ;;  %v500_v27 = vadd.f32 %v1810_v39, %v402_v23  ;;  %v431_v32 = vadd.f32 %v1804_v36, %v399_v25  ;;  %v434_v36 = vadd.f32 %v1821_v43, %v399_v25 }
 0x246   :  { %v728_v34 = vmul.f32 %v1846_v11, %v726_v33  ;;  %v877_v11 = vld [vmem:[%s2206_s9 + $0x48] sm:$0xff]  ;;  %v454_v33 = vadd.f32 %v1806_v37, %v400_v26  ;;  %v457_v37 = vadd.f32 %v1823_v44, %v400_v26 }
 0x247   :  { %v1142_v35 = vpop.eup %1141  ;;  %938 = vmatpush.msrb.mxu2 %v877_v11 }
 0x248   :  { %v723_v40 = vmul.f32 %v1142_v35, %v719_v28  ;;  %1125 = vmatmul.msk.f32.vlgmr.msra.gmra.mxu2 %vm105_vm0, %v728_v34  ;;  %1127 = vmatmul.msk.f32.vlgmr.msra.gmra.mxu3 %vm105_vm0, %v728_v34 }
 0x249   :  { %1129 = vmatmul.msk.f32.vlgmr.msrb.gmra.mxu0 %vm105_vm0, %v728_v34  ;;  %1081 = vrot.lane.b32.xlu0 %v728_v34, %s1149_s1 }
 0x24a   :  { %v725_v41 = vsub.f32 2.0, %v723_v40  ;;  %1131 = vmatmul.msk.f32.vlgmr.msrb.gmra.mxu1 %vm105_vm0, %v728_v34  ;;  %939 = vmatpush.msrb.mxu2 %v876_v50 }
 0x24c   :  { %v727_v42 = vmul.f32 %v1142_v35, %v725_v41  ;;  %940 = vmatpush.msrb.mxu2 %v875_v55 }
 0x24e   :  { %v2047_v47 = vmul.f32 %v1850_v14, %v727_v42  ;;  %v893_v14 = vld [vmem:[%s2206_s9 + $0xc8] sm:$0xff]  ;;  %941 = vmatpush.msrb.mxu2 %v874_v59  ;;  %v503_v42 = vadd.f32 %v1827_v46, %v402_v23  ;;  %v222_v59 = vadd.f32 %v1797_v60, %v99_v57  ;;  %v1150_v60 = vmov 64.0  }
 0x24f   :  { %961 = vmatpush.msrb.mxu3 %v893_v14  ;;  %1143 = vrcp.f32 %v1150_v60 }
 0x250   :  { %1126 = vmatmul.msk.f32.gmra.mxu2 %vm105_vm0, %v2047_v47  ;;  %1128 = vmatmul.msk.f32.gmra.mxu3 %vm105_vm0, %v2047_v47 }
 0x251   :  { %1130 = vmatmul.msk.f32.gmra.mxu0 %vm105_vm0, %v2047_v47  ;;  %962 = vmatpush.msrb.mxu3 %v892_v51 }
 0x252   :  { %1132 = vmatmul.msk.f32.gmra.mxu1 %vm105_vm0, %v2047_v47  ;;  %942 = vmatpush.msrb.mxu2 %v873_v0 }
 0x253   :  { %963 = vmatpush.msrb.mxu3 %v891_v56 }
 0x254   :  { %943 = vmatpush.msrb.mxu2 %v872_v4 }
 0x255   :  { %964 = vmatpush.msrb.mxu3 %v890_v61  ;;  %v1144_v10 = vpop.eup %1143 }
 0x256   :  { %944 = vmatpush.msrb.mxu2 %v871_v8  ;;  %v1033_v12 = vmul.f32 64.0, %v1144_v10  ;;  %vm1037_vm1 = vweird.f32 %v1144_v10 }
 0x257   :  { %965 = vmatpush.msrb.mxu3 %v889_v1 }
 0x258   :  { %945 = vmatpush.msrb.mxu2 %v870_v15  ;;  %v1034_v15 = vsub.f32 1.0, %v1033_v12 }
 0x259   :  { %966 = vmatpush.msrb.mxu3 %v888_v5 }
 0x25a   :  { %946 = vmatpush.msrb.mxu2 %v869_v17 }
 0x25b   :  { %967 = vmatpush.msrb.mxu3 %v887_v9 }
 0x25c   :  { %947 = vmatpush.msrb.mxu2 %v868_v19 }
 0x25d   :  { %968 = vmatpush.msrb.mxu3 %v886_v16  ;;  %v1035_v16 = vmul.f32 %v1144_v10, %v1034_v15 }
 0x25f   :  { %969 = vmatpush.msrb.mxu3 %v885_v18  ;;  %v1036_v17 = vadd.f32 %v1144_v10, %v1035_v16 }
 0x261   :  { %970 = vmatpush.msrb.mxu3 %v884_v20  ;;  %v1038_v18 = vsel %vm1037_vm1, %v1144_v10, %v1036_v17 }
 0x2c6   :  { %v831_v28 = vpop.f32.mrf.mxu0 }
 0x2c7   :  { %v862_v29 = vmul.f32 %v831_v28, %v477_v24  ;;  %v854_v30 = vpop.f32.mrf.mxu1 }
 0x2c8   :  { %v863_v31 = vmul.f32 %v854_v30, %v500_v27 }
 0x2c9   :  { %994 = vmatmul.f32.vlgmr.msra.gmra.mxu0 %v862_v29 }
 0x2ca   :  { %1017 = vmatmul.f32.vlgmr.msra.gmra.mxu1 %v863_v31 }
 0x2cb   :  { %v785_v34 = vpop.f32.mrf.mxu2  ;;  %v808_v35 = vpop.f32.mrf.mxu3 }
 0x2cc   :  { %v860_v40 = vmul.f32 %v785_v34, %v431_v32  ;;  %v861_v41 = vmul.f32 %v808_v35, %v454_v33 }
 0x2ce   :  { %v834_v11 = vpop.f32.mrf.mxu0  ;;  %948 = vmatmul.f32.vlgmr.msrb.gmra.mxu2 %v860_v40  ;;  %971 = vmatmul.f32.vlgmr.msrb.gmra.mxu3 %v861_v41 }
 0x2cf   :  { %v866_v39 = vmul.f32 %v834_v11, %v480_v38  ;;  %v857_v14 = vpop.f32.mrf.mxu1 }
 0x2d0   :  { %v867_v48 = vmul.f32 %v857_v14, %v503_v42 }
 0x2d1   :  { %997 = vmatmul.f32.gmra.mxu0 %v866_v39  ;;  %v46_v39 = vld [vmem:[%s2203_s10 + $0x4] ss:$0 sm:$0xff] }
 0x2d2   :  { %1020 = vmatmul.f32.gmra.mxu1 %v867_v48 }
 0x2d3   :  { %v788_v49 = vpop.f32.mrf.mxu2  ;;  %v811_v50 = vpop.f32.mrf.mxu3 }
 0x2d4   :  { %v864_v51 = vmul.f32 %v788_v49, %v434_v36  ;;  %v865_v52 = vmul.f32 %v811_v50, %v457_v37  ;;  %v47_v37 = vld [vmem:[%s2203_s10 + $0x5] ss:$0 sm:$0xff] }
 0x2d6   :  { %951 = vmatmul.f32.gmra.mxu2 %v864_v51  ;;  %974 = vmatmul.f32.gmra.mxu3 %v865_v52 }
 0x346   :  { %v995_v56 = vpop.f32.mrf.mxu0 }
 0x347   :  { %v1018_v58 = vpop.f32.mrf.mxu1 }
 0x34e   :  { %v998_v4 = vpop.f32.mrf.mxu0 }
 0x34f   :  { %v1021_v6 = vpop.f32.mrf.mxu1 }
 0x351   :  { %v949_v46 = vpop.f32.mrf.mxu2  ;;  %v972_v53 = vpop.f32.mrf.mxu3 }
 0x352   :  { %v950_v55 = vadd.f32 %v949_v46, %v45_v45 }
 0x354   :  { %v973_v43 = vadd.f32 %v972_v53, %v950_v55 }
 0x356   :  { %v996_v44 = vadd.f32 %v995_v56, %v973_v43 }
 0x358   :  { %v1019_v61 = vadd.f32 %v1018_v58, %v996_v44 }
 0x359   :  { %v952_v62 = vpop.f32.mrf.mxu2  ;;  %v975_v1 = vpop.f32.mrf.mxu3 }
 0x35a   :  { %v953_v63 = vadd.f32 %v952_v62, %v45_v45  ;;  %v1024_v0 = vadd.f32 %v1019_v61, %v222_v59  ;;  %v1082_v45 = vpop.permute.xlu0 %1081 }
 0x35c   :  { %v976_v2 = vadd.f32 %v975_v1, %v953_v63  ;;  %v1026_v3 = vsel %vm105_vm0, %v1024_v0, 0.0 }
 0x35d   :  { %1027 = vadd.xlane.f32.xlu1 %v1026_v3 }
 0x35e   :  { %v999_v5 = vadd.f32 %v998_v4, %v976_v2 }
 0x360   :  { %v1022_v54 = vadd.f32 %v1021_v6, %v999_v5 }
 0x362   :  { %v1025_v8 = vadd.f32 %v1022_v54, %v225_v7 }
 0x364   :  { %v1029_v9 = vsel %vm105_vm0, %v1025_v8, 0.0 }
 0x365   :  { %1030 = vadd.xlane.f32.xlu1 %v1029_v9 }
 0x37e   :  { %1083 = vrot.lane.b32.xlu1 %v2047_v47, %s1149_s1 }
 0x3d0   :  { %v1028_v19 = vpop.xlane.xlu1 %1027 }
 0x3d1   :  { %v1039_v20 = vmul.f32 %v1038_v18, %v1028_v19 }
 0x3d3   :  { %v1041_v13 = vsub.f32 %v1024_v0, %v1039_v20 }
 0x3d5   :  { %v1043_v21 = vmul.f32 %v1041_v13, %v1041_v13 }
 0x3d7   :  { %v1045_v22 = vsel %vm105_vm0, %v1043_v21, 0.0 }
 0x3d8   :  { %1046 = vadd.xlane.f32.xlu2 %v1045_v22  ;;  %v1031_v23 = vpop.xlane.xlu1 %1030 }
 0x3d9   :  { %v1040_v24 = vmul.f32 %v1038_v18, %v1031_v23 }
 0x3db   :  { %v1042_v25 = vsub.f32 %v1025_v8, %v1040_v24 }
 0x3dd   :  { %v1044_v47 = vmul.f32 %v1042_v25, %v1042_v25 }
 0x3df   :  { %v1048_v26 = vsel %vm105_vm0, %v1044_v47, 0.0 }
 0x3e0   :  { %1049 = vadd.xlane.f32.xlu2 %v1048_v26 }
 0x3f0   :  { %v1084_v58 = vpop.permute.xlu1 %1083 }
 0x44b   :  { %v1047_v27 = vpop.xlane.xlu2 %1046 }
 0x44c   :  { %v1051_v28 = vmul.f32 %v1047_v27, %v1038_v18 }
 0x44e   :  { %v1053_v29 = vadd.f32 1e-05, %v1051_v28 }
 0x450   :  { %1145 = vrsqrt.f32 %v1053_v29  ;;  %vm1061_vm3 = vweird.f32 %v1053_v29 }
 0x453   :  { %v1050_v30 = vpop.xlane.xlu2 %1049 }
 0x454   :  { %v1052_v31 = vmul.f32 %v1050_v30, %v1038_v18 }
 0x456   :  { %v1146_v32 = vpop.eup %1145  ;;  %v1054_v33 = vadd.f32 1e-05, %v1052_v31 }
 0x457   :  { %v1056_v34 = vmul.f32 %v1146_v32, %v1053_v29  ;;  %vm1062_vm2 = vweird.f32 %v1146_v32 }
 0x458   :  { %1147 = vrsqrt.f32 %v1054_v33  ;;  %vm1063_vm4 = vmor %vm1061_vm3, %vm1062_vm2  ;;  %vm1071_vm6 = vweird.f32 %v1054_v33 }
 0x459   :  { %v1057_v35 = vmul.f32 %v1146_v32, %v1056_v34 }
 0x45b   :  { %v1058_v40 = vmul.f32 0.5, %v1057_v35 }
 0x45d   :  { %v1059_v41 = vsub.f32 1.5, %v1058_v40 }
 0x45e   :  { %v1148_v38 = vpop.eup %1147 }
 0x45f   :  { %v1060_v42 = vmul.f32 %v1146_v32, %v1059_v41  ;;  %v1066_v11 = vmul.f32 %v1148_v38, %v1054_v33  ;;  %vm1072_vm5 = vweird.f32 %v1148_v38 }
 0x460   :  { %vm1073_vm7 = vmor %vm1071_vm6, %vm1072_vm5 }
 0x461   :  { %v1064_v14 = vsel %vm1063_vm4, %v1146_v32, %v1060_v42  ;;  %v1067_v48 = vmul.f32 %v1148_v38, %v1066_v11 }
 0x462   :  { %v1075_v36 = vmul.f32 %v1064_v14, %v1041_v13 }
 0x463   :  { %v1068_v49 = vmul.f32 0.5, %v1067_v48 }
 0x464   :  { %v1077_v50 = vmul.f32 %v1075_v36, %v46_v39 }
 0x465   :  { %v1069_v51 = vsub.f32 1.5, %v1068_v49 }
 0x466   :  { %v1079_v52 = vadd.f32 %v1077_v50, %v47_v37 }
 0x467   :  { %v1070_v46 = vmul.f32 %v1148_v38, %v1069_v51 }
 0x468   :  { %v1087_v53 = vsel %vm105_vm0, %v1079_v52, %v1082_v45 }
 0x469   :  { %1089 = vst [vmem:[%s2207_s11] sm:$0xff] %v1087_v53  ;;  %v1074_v55 = vsel %vm1073_vm7, %v1148_v38, %v1070_v46 }
 0x46a   :  { %v1076_v56 = vmul.f32 %v1074_v55, %v1042_v25 }
 0x46c   :  { %v1078_v57 = vmul.f32 %v1076_v56, %v46_v39 }
 0x46e   :  { %v1080_v43 = vadd.f32 %v1078_v57, %v47_v37 }
 0x470   :  { %v1088_v44 = vsel %vm105_vm0, %v1080_v43, %v1084_v58 }
 0x471   :  { %1090 = vst [vmem:[%s2207_s11 + $0x8] sm:$0xff] %v1088_v44 }

</bundles_post_ra>
